<compile_context>
chip_gen: v6e
topology: v6e:2x2x1
jax: 0.10.0
libtpu: 0.0.40
codegen_flags: <defaults>
</compile_context>

<pallas_src>
import functools

import jax
import jax.numpy as jnp
from jax import lax
from jax.experimental import pallas as pl
from jax.experimental.pallas import tpu as pltpu

LANE = 128                    # TPU lane width; feature dims are zero-padded to this
N_W_BLOCKS = 6                # enc1, enc2, mu, logvar, dec1, dec2 (all lane-dense)
BIAS_ROWS = 16                # bias block padded to a full bf16 sublane tile
W_OFF = [i * LANE for i in range(N_W_BLOCKS)]      # 0, 128, ..., 640
BIAS_OFF = N_W_BLOCKS * LANE                       # 768
PACKED_ROWS = BIAS_OFF + BIAS_ROWS                 # 784
PARAM_DTYPE = jnp.bfloat16    # bf16 weights feed the MXU directly; acc stays f32


# ----------------------------- Pallas kernel --------------------------------
def _vae_kernel(x_ref, eps_ref, p_ref, part_ref, *, d_in):
    """Full VAE forward for one batch tile; per-tile KL/rec partial sums out."""
    f32 = jnp.float32
    bf16 = jnp.bfloat16

    x = x_ref[...]                       # (TB, d_in) f32, native width (no HBM pad)
    eps = eps_ref[...]                   # (TB, 128) f32; lanes >= latent are zero

    # bf16 weight blocks straight off the packed slab -> native MXU fast path.
    w_enc1 = p_ref[W_OFF[0]:W_OFF[0] + d_in, :]      # (d_in, 128) bf16
    w_enc2 = p_ref[W_OFF[1]:W_OFF[1] + LANE, :]      # (128, 128) bf16
    w_mu   = p_ref[W_OFF[2]:W_OFF[2] + LANE, :]
    w_lv   = p_ref[W_OFF[3]:W_OFF[3] + LANE, :]
    w_dec1 = p_ref[W_OFF[4]:W_OFF[4] + LANE, :]      # full 128 rows (padded rows = 0)
    w_dec2 = p_ref[W_OFF[5]:W_OFF[5] + LANE, :]
    # Only the tiny bias block is up-cast to f32 (hoisted once per step).
    biases = p_ref[BIAS_OFF:BIAS_OFF + BIAS_ROWS, :].astype(f32)   # (16, 128)
    b_enc1 = biases[0:1, :]
    b_enc2 = biases[1:2, :]
    b_mu   = biases[2:3, :]
    b_lv   = biases[3:4, :]
    b_dec1 = biases[4:5, :]
    b_dec2 = biases[5:6, :]

    def dot(a, w):  # bf16 x bf16 MXU matmul with f32 accumulation
        return jnp.dot(a.astype(bf16), w, preferred_element_type=f32)

    # ---- encoder: Linear -> ReLU -> Linear ----
    h1 = jnp.maximum(dot(x, w_enc1) + b_enc1, 0.0)
    h = dot(h1, w_enc2) + b_enc2

    # ---- latent heads (lane-dense, zero-padded beyond `latent`) ----
    mu = dot(h, w_mu) + b_mu                 # padded lanes exactly 0
    logvar = dot(h, w_lv) + b_lv             # padded lanes exactly 0

    # ---- reparameterization (single exp; sigma^2 reused in KL) ----
    sigma = jnp.exp(0.5 * logvar)            # padded lanes exactly 1
    z = sigma * eps + mu                     # padded lanes exactly 0 (eps padded w/ 0)

    # ---- decoder: Linear -> ReLU -> Linear ----
    d1 = jnp.maximum(dot(z, w_dec1) + b_dec1, 0.0)
    rec_x = dot(d1, w_dec2) + b_dec2         # lanes >= d_in exactly 0

    # ---- per-tile loss partial sums (padded lanes contribute exactly 0) ----
    diff = x - rec_x[:, :d_in]
    kl = 0.5 * jnp.sum(-1.0 - logvar + mu * mu + sigma * sigma)
    rec = jnp.sum(diff * diff)

    # Lane-dense (1, 8, 128) partial-sum tile: kl at [0,0,0], rec at [0,0,1].
    sub = lax.broadcasted_iota(jnp.int32, (1, 8, LANE), 1)
    lane = lax.broadcasted_iota(jnp.int32, (1, 8, LANE), 2)
    part_ref[...] = jnp.where((sub == 0) & (lane == 0), kl,
                              jnp.where((sub == 0) & (lane == 1), rec, 0.0))


# ----------------------------- param packing --------------------------------
def pack_params(params):
    """Pack all weights/biases into one zero-padded (784, 128) bf16 slab.

    Six (128, 128) weight blocks (enc1, enc2, mu, logvar, dec1, dec2) followed
    by a (16, 128) bias block (one bias per row).  Assumes every feature dim
    <= 128 (true for this config).
    """
    def pad_block(w):
        r, c = w.shape
        assert r <= LANE and c <= LANE, "pack_params assumes feature dims <= 128"
        return jnp.pad(w.astype(jnp.float32), ((0, LANE - r), (0, LANE - c)))

    blocks = [
        pad_block(params["enc_w1"]), pad_block(params["enc_w2"]),
        pad_block(params["mu_w"]), pad_block(params["lv_w"]),
        pad_block(params["dec_w1"]), pad_block(params["dec_w2"]),
    ]
    bias_block = jnp.zeros((BIAS_ROWS, LANE), jnp.float32)
    for r, b in enumerate([params["enc_b1"], params["enc_b2"], params["mu_b"],
                           params["lv_b"], params["dec_b1"], params["dec_b2"]]):
        bias_block = bias_block.at[r, : b.shape[1]].set(b[0].astype(jnp.float32))

    packed = jnp.concatenate(blocks + [bias_block], axis=0)
    assert packed.shape == (PACKED_ROWS, LANE)
    return packed.astype(PARAM_DTYPE)


# ----------------------------- wrapper ---------------------------------------
def vae_forward(x, eps, packed, kl_weight, *, tile_b=256):
    """Returns (kl_weight * kl_div + rec_loss, rec_loss) as f32 scalars."""
    b, d_in = x.shape
    latent = eps.shape[1]
    tile_b = min(tile_b, b)
    assert b % tile_b == 0, "batch must be a multiple of tile_b"
    num_tiles = b // tile_b

    # Lane-dense eps stream (zero padding contributes exactly 0 to z / losses).
    eps_pad = jnp.pad(eps, ((0, 0), (0, LANE - latent)))

    kernel = functools.partial(_vae_kernel, d_in=d_in)

    flops = 2 * b * (d_in * LANE + 5 * LANE * LANE)
    bytes_accessed = (x.size * 4 + b * LANE * 4 + PACKED_ROWS * LANE * 2
                      + num_tiles * 8 * LANE * 4)

    parts = pl.pallas_call(
        kernel,
        out_shape=jax.ShapeDtypeStruct((num_tiles, 8, LANE), jnp.float32),
        grid=(num_tiles,),
        in_specs=[
            pl.BlockSpec((tile_b, d_in), lambda i: (i, 0)),        # x, batch-tiled, unpadded
            pl.BlockSpec((tile_b, LANE), lambda i: (i, 0)),        # eps, batch-tiled, lane-dense
            pl.BlockSpec((PACKED_ROWS, LANE), lambda i: (0, 0)),   # packed bf16 params, resident
        ],
        out_specs=pl.BlockSpec((1, 8, LANE), lambda i: (i, 0, 0)), # per-tile partial sums
        compiler_params=pltpu.CompilerParams(
            # Per-tile independent partial sums -> batch axis is safely parallel
            # (v7x megacore splits tiles across its two TensorCores).
            dimension_semantics=("parallel",),
        ),
        cost_estimate=pl.CostEstimate(flops=flops, transcendentals=b * LANE,
                                      bytes_accessed=bytes_accessed),
    )(x, eps_pad, packed)

    kl_sum = jnp.sum(parts[:, 0, 0])
    rec_sum = jnp.sum(parts[:, 0, 1])
    return kl_weight * kl_sum + rec_sum, rec_sum


# ----------------------------- param init ------------------------------------
def init_params(key, d_in, hidden, bound_fc, latent_dim):
    ks = jax.random.split(key, 8)

    def linear(k, fan_in, fan_out):
        w = jax.random.normal(k, (fan_in, fan_out), jnp.float32) / jnp.sqrt(float(fan_in))
        b = jnp.zeros((1, fan_out), jnp.float32)
        return w, b

    enc_w1, enc_b1 = linear(ks[0], d_in, hidden)
    enc_w2, enc_b2 = linear(ks[1], hidden, bound_fc)
    mu_w, mu_b = linear(ks[2], bound_fc, latent_dim)
    lv_w, lv_b = linear(ks[3], bound_fc, latent_dim)
    dec_w1, dec_b1 = linear(ks[4], latent_dim, hidden)
    dec_w2, dec_b2 = linear(ks[5], hidden, d_in)
    return dict(
        enc_w1=enc_w1, enc_b1=enc_b1, enc_w2=enc_w2, enc_b2=enc_b2,
        mu_w=mu_w, mu_b=mu_b, lv_w=lv_w, lv_b=lv_b,
        dec_w1=dec_w1, dec_b1=dec_b1, dec_w2=dec_w2, dec_b2=dec_b2,
    )


# ----------------------------- reference (plain JAX) -------------------------
def vae_forward_ref(x, eps, params, kl_weight):
    """Mirrors the kernel's numerics: bf16 weights/activations on the MXU, f32 acc."""
    bf = lambda a: a.astype(jnp.bfloat16)
    up = lambda a: a.astype(jnp.bfloat16).astype(jnp.float32)

    def lin(a, w, b):
        return jnp.dot(bf(a), bf(w), preferred_element_type=jnp.float32) + up(b)

    h1 = jnp.maximum(lin(x, params["enc_w1"], params["enc_b1"]), 0.0)
    h = lin(h1, params["enc_w2"], params["enc_b2"])
    mu = lin(h, params["mu_w"], params["mu_b"])
    logvar = lin(h, params["lv_w"], params["lv_b"])
    z = jnp.exp(0.5 * logvar) * eps + mu
    d1 = jnp.maximum(lin(z, params["dec_w1"], params["dec_b1"]), 0.0)
    rec_x = lin(d1, params["dec_w2"], params["dec_b2"])
    kl = 0.5 * jnp.sum(-1.0 - logvar + mu ** 2 + jnp.exp(logvar))
    rec = jnp.sum((x - rec_x) ** 2)
    return kl_weight * kl + rec, rec


if __name__ == "__main__":
    B, D_IN, HIDDEN, BOUND_FC, LATENT = 512, 64, 32, 16, 16
    TILE_B = 256
    KL_WEIGHT = 10.0

    key = jax.random.PRNGKey(0)
    k_x, k_eps, k_p = jax.random.split(key, 3)

    x = jax.random.normal(k_x, (B, D_IN), jnp.float32)
    eps = jax.random.normal(k_eps, (B, LATENT), jnp.float32)   # torch.randn_like(mu)
    params = init_params(k_p, D_IN, HIDDEN, BOUND_FC, LATENT)

    packed = pack_params(params)
    kl_w = jnp.float32(KL_WEIGHT)   # runtime scalar -> no recompiles

    fwd = jax.jit(functools.partial(vae_forward, tile_b=TILE_B))
    loss, rec_loss = fwd(x, eps, packed, kl_w)
    jax.block_until_ready((loss, rec_loss))

    # cross-check against plain-JAX reference (same bf16 matmul numerics)
    loss_ref, rec_ref = vae_forward_ref(x, eps, params, KL_WEIGHT)
    assert jnp.allclose(loss, loss_ref, rtol=5e-3, atol=1e-1), (loss, loss_ref)
    assert jnp.allclose(rec_loss, rec_ref, rtol=5e-3, atol=1e-1), (rec_loss, rec_ref)

    print("KERNEL_OK")
</pallas_src>

<mosaic_0001>
module attributes {stable_mosaic.version = 11 : i64} {
  func.func @_vae_kernel(%arg0: i32, %arg1: memref<256x64xf32, #tpu.memory_space<vmem>>, %arg2: memref<256x128xf32, #tpu.memory_space<vmem>>, %arg3: memref<784x128xbf16, #tpu.memory_space<vmem>>, %arg4: memref<1x8x128xf32, #tpu.memory_space<vmem>>) attributes {dimension_semantics = [#tpu.dimension_semantics<parallel>], iteration_bounds = array<i64: 2>, scalar_prefetch = 0 : i64, scratch_operands = 0 : i64, tpu.core_type = #tpu.core_type<tc>, window_params = [{transform_indices = @transform_0, window_bounds = array<i64: 256, 64>}, {transform_indices = @transform_1, window_bounds = array<i64: 256, 128>}, {pipeline_mode = #tpu.pipeline_mode<synchronous>, transform_indices = @transform_2, window_bounds = array<i64: 784, 128>}, {transform_indices = @transform_3, window_bounds = array<i64: 1, 8, 128>}]} {
    %c0 = arith.constant 0 : index
    %c0_0 = arith.constant 0 : index
    %0 = vector.load %arg1[%c0, %c0_0] : memref<256x64xf32, #tpu.memory_space<vmem>>, vector<256x64xf32>
    %c0_1 = arith.constant 0 : index
    %c0_2 = arith.constant 0 : index
    %1 = vector.load %arg2[%c0_1, %c0_2] : memref<256x128xf32, #tpu.memory_space<vmem>>, vector<256x128xf32>
    %c0_3 = arith.constant 0 : index
    %c0_4 = arith.constant 0 : index
    %2 = vector.load %arg3[%c0_3, %c0_4] : memref<784x128xbf16, #tpu.memory_space<vmem>>, vector<64x128xbf16>
    %c128 = arith.constant 128 : index
    %c0_5 = arith.constant 0 : index
    %3 = vector.load %arg3[%c128, %c0_5] : memref<784x128xbf16, #tpu.memory_space<vmem>>, vector<128x128xbf16>
    %c256 = arith.constant 256 : index
    %c0_6 = arith.constant 0 : index
    %4 = vector.load %arg3[%c256, %c0_6] : memref<784x128xbf16, #tpu.memory_space<vmem>>, vector<128x128xbf16>
    %c384 = arith.constant 384 : index
    %c0_7 = arith.constant 0 : index
    %5 = vector.load %arg3[%c384, %c0_7] : memref<784x128xbf16, #tpu.memory_space<vmem>>, vector<128x128xbf16>
    %c512 = arith.constant 512 : index
    %c0_8 = arith.constant 0 : index
    %6 = vector.load %arg3[%c512, %c0_8] : memref<784x128xbf16, #tpu.memory_space<vmem>>, vector<128x128xbf16>
    %c640 = arith.constant 640 : index
    %c0_9 = arith.constant 0 : index
    %7 = vector.load %arg3[%c640, %c0_9] : memref<784x128xbf16, #tpu.memory_space<vmem>>, vector<128x128xbf16>
    %c768 = arith.constant 768 : index
    %c0_10 = arith.constant 0 : index
    %8 = vector.load %arg3[%c768, %c0_10] : memref<784x128xbf16, #tpu.memory_space<vmem>>, vector<16x128xbf16>
    %9 = arith.extf %8 : vector<16x128xbf16> to vector<16x128xf32>
    %10 = vector.extract_strided_slice %9 {offsets = [0, 0], sizes = [1, 128], strides = [1, 1]} : vector<16x128xf32> to vector<1x128xf32>
    %11 = vector.extract_strided_slice %9 {offsets = [1, 0], sizes = [1, 128], strides = [1, 1]} : vector<16x128xf32> to vector<1x128xf32>
    %12 = vector.extract_strided_slice %9 {offsets = [2, 0], sizes = [1, 128], strides = [1, 1]} : vector<16x128xf32> to vector<1x128xf32>
    %13 = vector.extract_strided_slice %9 {offsets = [3, 0], sizes = [1, 128], strides = [1, 1]} : vector<16x128xf32> to vector<1x128xf32>
    %14 = vector.extract_strided_slice %9 {offsets = [4, 0], sizes = [1, 128], strides = [1, 1]} : vector<16x128xf32> to vector<1x128xf32>
    %15 = vector.extract_strided_slice %9 {offsets = [5, 0], sizes = [1, 128], strides = [1, 1]} : vector<16x128xf32> to vector<1x128xf32>
    %16 = arith.truncf %0 : vector<256x64xf32> to vector<256x64xbf16>
    %cst = arith.constant dense<0.000000e+00> : vector<256x128xf32>
    %17 = tpu.matmul %16, %2, %cst {dimension_numbers = #tpu.dot_dimension_numbers<[1], [0], [0], [1], [0, 0, 1, 1], [], []>} : vector<256x64xbf16>, vector<64x128xbf16>, vector<256x128xf32> -> vector<256x128xf32>
    %18 = vector.broadcast %10 : vector<1x128xf32> to vector<256x128xf32>
    %19 = arith.addf %17, %18 : vector<256x128xf32>
    %cst_11 = arith.constant 0.000000e+00 : f32
    %20 = vector.broadcast %cst_11 : f32 to vector<256x128xf32>
    %21 = arith.maximumf %19, %20 : vector<256x128xf32>
    %22 = arith.truncf %21 : vector<256x128xf32> to vector<256x128xbf16>
    %cst_12 = arith.constant dense<0.000000e+00> : vector<256x128xf32>
    %23 = tpu.matmul %22, %3, %cst_12 {dimension_numbers = #tpu.dot_dimension_numbers<[1], [0], [0], [1], [0, 0, 1, 1], [], []>} : vector<256x128xbf16>, vector<128x128xbf16>, vector<256x128xf32> -> vector<256x128xf32>
    %24 = vector.broadcast %11 : vector<1x128xf32> to vector<256x128xf32>
    %25 = arith.addf %23, %24 : vector<256x128xf32>
    %26 = arith.truncf %25 : vector<256x128xf32> to vector<256x128xbf16>
    %cst_13 = arith.constant dense<0.000000e+00> : vector<256x128xf32>
    %27 = tpu.matmul %26, %4, %cst_13 {dimension_numbers = #tpu.dot_dimension_numbers<[1], [0], [0], [1], [0, 0, 1, 1], [], []>} : vector<256x128xbf16>, vector<128x128xbf16>, vector<256x128xf32> -> vector<256x128xf32>
    %28 = vector.broadcast %12 : vector<1x128xf32> to vector<256x128xf32>
    %29 = arith.addf %27, %28 : vector<256x128xf32>
    %30 = arith.truncf %25 : vector<256x128xf32> to vector<256x128xbf16>
    %cst_14 = arith.constant dense<0.000000e+00> : vector<256x128xf32>
    %31 = tpu.matmul %30, %5, %cst_14 {dimension_numbers = #tpu.dot_dimension_numbers<[1], [0], [0], [1], [0, 0, 1, 1], [], []>} : vector<256x128xbf16>, vector<128x128xbf16>, vector<256x128xf32> -> vector<256x128xf32>
    %32 = vector.broadcast %13 : vector<1x128xf32> to vector<256x128xf32>
    %33 = arith.addf %31, %32 : vector<256x128xf32>
    %cst_15 = arith.constant 5.000000e-01 : f32
    %34 = vector.broadcast %cst_15 : f32 to vector<256x128xf32>
    %35 = arith.mulf %34, %33 : vector<256x128xf32>
    %36 = math.exp %35 : vector<256x128xf32>
    %37 = arith.mulf %36, %1 : vector<256x128xf32>
    %38 = arith.addf %37, %29 : vector<256x128xf32>
    %39 = arith.truncf %38 : vector<256x128xf32> to vector<256x128xbf16>
    %cst_16 = arith.constant dense<0.000000e+00> : vector<256x128xf32>
    %40 = tpu.matmul %39, %6, %cst_16 {dimension_numbers = #tpu.dot_dimension_numbers<[1], [0], [0], [1], [0, 0, 1, 1], [], []>} : vector<256x128xbf16>, vector<128x128xbf16>, vector<256x128xf32> -> vector<256x128xf32>
    %41 = vector.broadcast %14 : vector<1x128xf32> to vector<256x128xf32>
    %42 = arith.addf %40, %41 : vector<256x128xf32>
    %cst_17 = arith.constant 0.000000e+00 : f32
    %43 = vector.broadcast %cst_17 : f32 to vector<256x128xf32>
    %44 = arith.maximumf %42, %43 : vector<256x128xf32>
    %45 = arith.truncf %44 : vector<256x128xf32> to vector<256x128xbf16>
    %cst_18 = arith.constant dense<0.000000e+00> : vector<256x128xf32>
    %46 = tpu.matmul %45, %7, %cst_18 {dimension_numbers = #tpu.dot_dimension_numbers<[1], [0], [0], [1], [0, 0, 1, 1], [], []>} : vector<256x128xbf16>, vector<128x128xbf16>, vector<256x128xf32> -> vector<256x128xf32>
    %47 = vector.broadcast %15 : vector<1x128xf32> to vector<256x128xf32>
    %48 = arith.addf %46, %47 : vector<256x128xf32>
    %49 = vector.extract_strided_slice %48 {offsets = [0, 0], sizes = [256, 64], strides = [1, 1]} : vector<256x128xf32> to vector<256x64xf32>
    %50 = arith.subf %0, %49 : vector<256x64xf32>
    %cst_19 = arith.constant -1.000000e+00 : f32
    %51 = vector.broadcast %cst_19 : f32 to vector<256x128xf32>
    %52 = arith.subf %51, %33 : vector<256x128xf32>
    %53 = arith.mulf %29, %29 : vector<256x128xf32>
    %54 = arith.addf %52, %53 : vector<256x128xf32>
    %55 = arith.mulf %36, %36 : vector<256x128xf32>
    %56 = arith.addf %54, %55 : vector<256x128xf32>
    %57 = vector.shape_cast %56 : vector<256x128xf32> to vector<1x256x128xf32>
    %cst_20 = arith.constant dense<0.000000e+00> : vector<1xf32>
    %58 = vector.multi_reduction <add>, %57, %cst_20 [1, 2] : vector<1x256x128xf32> to vector<1xf32>
    %59 = vector.shape_cast %58 : vector<1xf32> to vector<1x1x1xf32>
    %60 = vector.extract %59[0, 0, 0] : f32 from vector<1x1x1xf32>
    %cst_21 = arith.constant 5.000000e-01 : f32
    %61 = arith.mulf %cst_21, %60 : f32
    %62 = arith.mulf %50, %50 : vector<256x64xf32>
    %63 = vector.shape_cast %62 : vector<256x64xf32> to vector<1x256x64xf32>
    %cst_22 = arith.constant dense<0.000000e+00> : vector<1xf32>
    %64 = vector.multi_reduction <add>, %63, %cst_22 [1, 2] : vector<1x256x64xf32> to vector<1xf32>
    %65 = vector.shape_cast %64 : vector<1xf32> to vector<1x1x1xf32>
    %66 = vector.extract %65[0, 0, 0] : f32 from vector<1x1x1xf32>
    %67 = tpu.iota {dimensions = array<i32: 1>} : vector<1x8x128xi32>
    %68 = tpu.iota {dimensions = array<i32: 2>} : vector<1x8x128xi32>
    %c0_i32 = arith.constant 0 : i32
    %69 = vector.broadcast %c0_i32 : i32 to vector<1x8x128xi32>
    %70 = arith.cmpi eq, %67, %69 : vector<1x8x128xi32>
    %c0_i32_23 = arith.constant 0 : i32
    %71 = vector.broadcast %c0_i32_23 : i32 to vector<1x8x128xi32>
    %72 = arith.cmpi eq, %68, %71 : vector<1x8x128xi32>
    %73 = arith.andi %70, %72 : vector<1x8x128xi1>
    %c0_i32_24 = arith.constant 0 : i32
    %74 = vector.broadcast %c0_i32_24 : i32 to vector<1x8x128xi32>
    %75 = arith.cmpi eq, %67, %74 : vector<1x8x128xi32>
    %c1_i32 = arith.constant 1 : i32
    %76 = vector.broadcast %c1_i32 : i32 to vector<1x8x128xi32>
    %77 = arith.cmpi eq, %68, %76 : vector<1x8x128xi32>
    %78 = arith.andi %75, %77 : vector<1x8x128xi1>
    %cst_25 = arith.constant 0.000000e+00 : f32
    %79 = vector.broadcast %66 : f32 to vector<1x8x128xf32>
    %80 = vector.broadcast %cst_25 : f32 to vector<1x8x128xf32>
    %81 = arith.select %78, %79, %80 : vector<1x8x128xi1>, vector<1x8x128xf32>
    %82 = vector.broadcast %61 : f32 to vector<1x8x128xf32>
    %83 = arith.select %73, %82, %81 : vector<1x8x128xi1>, vector<1x8x128xf32>
    %c0_26 = arith.constant 0 : index
    %c0_27 = arith.constant 0 : index
    %c0_28 = arith.constant 0 : index
    %84 = vector.load %arg4[%c0_26, %c0_27, %c0_28] : memref<1x8x128xf32, #tpu.memory_space<vmem>>, vector<1x8x128xf32>
    tpu.vector_store %arg4[%c0_26, %c0_27, %c0_28], %83 {strides = array<i32>} : memref<1x8x128xf32, #tpu.memory_space<vmem>>, vector<1x8x128xf32>,
    return
  }
  func.func @transform_0(%arg0: i32) -> (i32, i32) {
    %c0_i32 = arith.constant 0 : i32
    %c0_i32_0 = arith.constant 0 : i32
    return %arg0, %c0_i32 : i32, i32
  }
  func.func @transform_1(%arg0: i32) -> (i32, i32) {
    %c0_i32 = arith.constant 0 : i32
    %c0_i32_0 = arith.constant 0 : i32
    return %arg0, %c0_i32 : i32, i32
  }
  func.func @transform_2(%arg0: i32) -> (i32, i32) {
    %c0_i32 = arith.constant 0 : i32
    %c0_i32_0 = arith.constant 0 : i32
    %c0_i32_1 = arith.constant 0 : i32
    return %c0_i32, %c0_i32_0 : i32, i32
  }
  func.func @transform_3(%arg0: i32) -> (i32, i32, i32) {
    %c0_i32 = arith.constant 0 : i32
    %c0_i32_0 = arith.constant 0 : i32
    %c0_i32_1 = arith.constant 0 : i32
    return %arg0, %c0_i32, %c0_i32_0 : i32, i32, i32
  }
}

</mosaic_0001>

<bundles_post_ra>
// kernel: vae_forward.1
= control target key start
LH: loop header
LB: loop body
LE: loop exit
PB: predicated region body
PF: predicated region fallthrough
CT: control target
= control target key end

     0   :  { %s3059_s12 = smov 0   ;;  %s4066_s0 = inlined_call_operand.vmem [shape: f32[512,64], index: 0, kind: input, shape index: {}]   ;;  %s4067_s1 = inlined_call_operand.vmem [shape: f32[512,128], index: 1, kind: input, shape index: {}]   ;;  %s4068_s2 = inlined_call_operand.vmem [shape: bf16[784,128], index: 2, kind: input, shape index: {}]   ;;  %s4069_s3 = inlined_call_operand.vmem [shape: f32[2,8,128], index: 3, kind: output, shape index: {}]  }
   0x1 LB: > { %s3065_s13 = sadd.s32 4294967295, %s3037_s12   ;;  %p2375_p0 = scmp.ge.s32.totalorder %s3037_s12, 1  ;;  %s3037_s12 = sphi %s3059_s12, %s13_s12  }
   0x2   : > { %p149_p1 = scmp.lt.s32.totalorder %s3037_s12, 3 }
   0x4   : > { %p150_p2 = pnand %p2375_p0, %p149_p1 }
   0x6   : > { %153 = sbr.rel (%p150_p2) target bundleno = 1375 (0x55f), region = 32 }
   0xb   : > { %v2891_v0 = vld [vmem:[%s4068_s2 + $0x18] sm:$0xff]   ;;  %s2376_s16 = sshll.u32 %s3065_s13, 5  ;;  %v2892_v1 = vld [vmem:[%s4068_s2 + $0x10] sm:$0xff]   ;;  %v2893_v2 = vld [vmem:[%s4068_s2 + $0x8] sm:$0xff]   ;;  %vm392_vm0 = vcmask 523264   ;;  %p189_p4 = scmp.lt.s32.totalorder %s3065_s13, 1 }
   0xc   : > { %p178_p3 = scmp.lt.s32.totalorder %s2376_s16, 63  ;;  %2583 = vmatprep.subr.bf16.mxu0 %v2891_v0  ;;  %v2895_v3 = vld [vmem:[%s4068_s2 + $0x78] sm:$0xff]   ;;  %v2896_v4 = vld [vmem:[%s4068_s2 + $0x70] sm:$0xff]   ;;  %v2894_v7 = vld [vmem:[%s4068_s2] sm:$0xff]  }
   0xd   : > { %2584 = vmatpush3.bf16.msra.mxu0 %v2891_v0  ;;  %2623 = vmatprep.subr.bf16.mxu1 %v2895_v3  ;;  %v2897_v9 = vld [vmem:[%s4068_s2 + $0x68] sm:$0xff]   ;;  %v2898_v19 = vld [vmem:[%s4068_s2 + $0x60] sm:$0xff]   ;;  %v2899_v21 = vld [vmem:[%s4068_s2 + $0x58] sm:$0xff]   ;;  %s4104_s13 = smov (!%p189_p4, %s3065_s13), 1 }
   0xe   : > { %s4102_s16 = smov (!%p178_p3, %s2376_s16), 63  ;;  %2585 = vmatprep.subr.bf16.mxu0 %v2892_v1  ;;  %2624 = vmatpush3.bf16.msra.mxu1 %v2895_v3  ;;  %v2900_v57 = vld [vmem:[%s4068_s2 + $0x50] sm:$0xff]   ;;  %v2901_v58 = vld [vmem:[%s4068_s2 + $0x48] sm:$0xff]   ;;  %v2902_v59 = vld [vmem:[%s4068_s2 + $0x40] sm:$0xff]   ;;  %s2380_s21 = sshll.u32 %s4104_s13, 3 }
   0xf   : > { %s2377_s23 = sshll.u32 %s4102_s16, 3  ;;  %2625 = vmatprep.subr.bf16.mxu1 %v2896_v4  ;;  %v2903_v60 = vld [vmem:[%s4068_s2 + $0xf8] sm:$0xff]   ;;  %v2908_v62 = vld [vmem:[%s4068_s2 + $0xb0] sm:$0xff]   ;;  %v2910_v63 = vld [vmem:[%s4068_s2 + $0xa8] sm:$0xff]   ;;  %s192_s26 = scalar_lea.vmem %s4069_s3, %s2380_s21 }
  0x10   : > { %s3093_s28 = scalar_lea.vmem %s4066_s0, %s2377_s23  ;;  %v2906_v61 = vld [vmem:[%s4068_s2 + $0xb8] sm:$0xff]   ;;  %v2912_v0 = vld [vmem:[%s4068_s2 + $0xa0] sm:$0xff]   ;;  %s3564_s19 = scalar_lea.vmem %s4067_s1, %s2377_s23 }
  0x11   : > { %2586 = vmatpush3.bf16.msra.mxu0 %v2892_v1  ;;  %v194_v5 = vld [vmem:[%s3093_s28] sm:$0xff]  ;;  %v195_v6 = vld [vmem:[%s3093_s28 + $0x8] sm:$0xff]  ;;  %v196_v10 = vld [vmem:[%s3093_s28 + $0x10] sm:$0xff] }
  0x12   : > { %2587 = vmatprep.subr.bf16.mxu0 %v2893_v2  ;;  %v348_v8 = vpack.c.bf16 %v195_v6, %v194_v5  ;;  %v197_v11 = vld [vmem:[%s3093_s28 + $0x18] sm:$0xff]  ;;  %2626 = vmatpush3.bf16.msra.mxu1 %v2896_v4  ;;  %v198_v12 = vld [vmem:[%s3093_s28 + $0x20] sm:$0xff]  ;;  %v199_v13 = vld [vmem:[%s3093_s28 + $0x28] sm:$0xff] }
  0x13   : > { %2627 = vmatprep.subr.bf16.mxu1 %v2897_v9  ;;  %v349_v14 = vpack.c.bf16 %v197_v11, %v196_v10  ;;  %v350_v15 = vpack.c.bf16 %v199_v13, %v198_v12  ;;  %v200_v16 = vld [vmem:[%s3093_s28 + $0x30] sm:$0xff]  ;;  %v201_v17 = vld [vmem:[%s3093_s28 + $0x38] sm:$0xff]  ;;  %v202_v18 = vld [vmem:[%s3093_s28 + $0x40] sm:$0xff] }
  0x14   : > { %2591 = vmatprep.mubr.msk.bf16.mxu0 %vm392_vm0, %v348_v8  ;;  %v203_v20 = vld [vmem:[%s3093_s28 + $0x48] sm:$0xff]  ;;  %v351_v22 = vpack.c.bf16 %v201_v17, %v200_v16  ;;  %v204_v24 = vld [vmem:[%s3093_s28 + $0x50] sm:$0xff]  ;;  %v205_v25 = vld [vmem:[%s3093_s28 + $0x58] sm:$0xff] }
  0x15   : > { %2588 = vmatpush3.bf16.msra.mxu0 %v2893_v2  ;;  %v352_v23 = vpack.c.bf16 %v203_v20, %v202_v18  ;;  %v206_v26 = vld [vmem:[%s3093_s28 + $0x60] sm:$0xff]  ;;  %v207_v27 = vld [vmem:[%s3093_s28 + $0x68] sm:$0xff]  ;;  %v353_v28 = vpack.c.bf16 %v205_v25, %v204_v24  ;;  %v208_v30 = vld [vmem:[%s3093_s28 + $0x70] sm:$0xff]  ;;  %v4070_v2 = vlaneseq }
  0x16   : > { %2589 = vmatprep.subr.bf16.mxu0 %v2894_v7  ;;  %2628 = vmatpush3.bf16.msra.mxu1 %v2897_v9  ;;  %v354_v29 = vpack.c.bf16 %v207_v27, %v206_v26  ;;  %v209_v31 = vld [vmem:[%s3093_s28 + $0x78] sm:$0xff]  ;;  %v210_v32 = vld [vmem:[%s3093_s28 + $0x80] sm:$0xff]  ;;  %v211_v33 = vld [vmem:[%s3093_s28 + $0x88] sm:$0xff] }
  0x17   : > { %2629 = vmatprep.subr.bf16.mxu1 %v2898_v19  ;;  %v355_v34 = vpack.c.bf16 %v209_v31, %v208_v30  ;;  %v356_v35 = vpack.c.bf16 %v211_v33, %v210_v32  ;;  %v212_v36 = vld [vmem:[%s3093_s28 + $0x90] sm:$0xff]  ;;  %v213_v37 = vld [vmem:[%s3093_s28 + $0x98] sm:$0xff]  ;;  %v214_v38 = vld [vmem:[%s3093_s28 + $0xa0] sm:$0xff]  ;;  %v3183_v3 = vshrl.u32 %v4070_v2, 7 }
  0x18   : > { %v215_v39 = vld [vmem:[%s3093_s28 + $0xa8] sm:$0xff]  ;;  %v357_v40 = vpack.c.bf16 %v213_v37, %v212_v36  ;;  %v216_v42 = vld [vmem:[%s3093_s28 + $0xb0] sm:$0xff]  ;;  %v217_v43 = vld [vmem:[%s3093_s28 + $0xb8] sm:$0xff] }
  0x19   : > { %2590 = vmatpush3.bf16.msra.mxu0 %v2894_v7  ;;  %v358_v41 = vpack.c.bf16 %v215_v39, %v214_v38  ;;  %v218_v44 = vld [vmem:[%s3093_s28 + $0xc0] sm:$0xff]  ;;  %v219_v45 = vld [vmem:[%s3093_s28 + $0xc8] sm:$0xff]  ;;  %v359_v46 = vpack.c.bf16 %v217_v43, %v216_v42  ;;  %v220_v48 = vld [vmem:[%s3093_s28 + $0xd0] sm:$0xff]  ;;  %4083 = vst [vmem:[#allocation2_spill] sm:$0xff] %v3183_v3  ;;  %v366_v6 = vsub.s32 0, %v3183_v3 }
  0x1a   : > { %2630 = vmatpush3.bf16.msra.mxu1 %v2898_v19  ;;  %v360_v47 = vpack.c.bf16 %v219_v45, %v218_v44  ;;  %v221_v49 = vld [vmem:[%s3093_s28 + $0xd8] sm:$0xff]  ;;  %v222_v50 = vld [vmem:[%s3093_s28 + $0xe0] sm:$0xff]  ;;  %v223_v51 = vld [vmem:[%s3093_s28 + $0xe8] sm:$0xff]  ;;  %2671 = vmatprep.subr.bf16.mxu0 %v2906_v61 }
  0x1b   : > { %2631 = vmatprep.subr.bf16.mxu1 %v2899_v21  ;;  %v361_v52 = vpack.c.bf16 %v221_v49, %v220_v48  ;;  %v362_v53 = vpack.c.bf16 %v223_v51, %v222_v50  ;;  %v224_v54 = vld [vmem:[%s3093_s28 + $0xf0] sm:$0xff]  ;;  %v225_v55 = vld [vmem:[%s3093_s28 + $0xf8] sm:$0xff]  ;;  %v346_v4 = vld [vmem:[%s4068_s2 + $0x180] sm:$0xf] }
  0x1c   : > { %2592 = vmatmul.mubr.msk.bf16.vlgmr.msra.gmra.mxu0 %vm392_vm0, %v349_v14  ;;  %v363_v56 = vpack.c.bf16 %v225_v55, %v224_v54  ;;  %v2914_v1 = vld [vmem:[%s4068_s2 + $0x98] sm:$0xff]   ;;  %v3188_v5 = vunpack.c.l.bf16 %v346_v4  ;;  %v2904_v25 = vld [vmem:[%s4068_s2 + $0xf0] sm:$0xff]   ;;  %v2905_v33 = vld [vmem:[%s4068_s2 + $0xe8] sm:$0xff]  }
  0x1d   : > { %2595 = vmatprep.mubr.msk.bf16.mxu0 %vm392_vm0, %v350_v15  ;;  %2672 = vmatpush3.bf16.msra.mxu0 %v2906_v61  ;;  %v2909_v49 = vld [vmem:[%s4068_s2 + $0xd8] sm:$0xff]  }
  0x1e   : > { %2632 = vmatpush3.bf16.msra.mxu1 %v2899_v21  ;;  %2673 = vmatprep.subr.bf16.mxu0 %v2908_v62  ;;  %4084 = vst [vmem:[#allocation3_spill] sm:$0xff] %v3188_v5  ;;  %v3192_v8 = vrot.slane %v3188_v5, %v366_v6 }
  0x1f   : > { %2633 = vmatprep.subr.bf16.mxu1 %v2900_v57 }
  0x21   : > { %2674 = vmatpush3.bf16.msra.mxu0 %v2908_v62 }
  0x22   : > { %2634 = vmatpush3.bf16.msra.mxu1 %v2900_v57  ;;  %2675 = vmatprep.subr.bf16.mxu0 %v2910_v63  ;;  %v2911_v57 = vld [vmem:[%s4068_s2 + $0xd0] sm:$0xff]  }
  0x23   : > { %2635 = vmatprep.subr.bf16.mxu1 %v2901_v58 }
  0x24   : > { %2596 = vmatmul.mubr.msk.bf16.gmra.mxu0 %vm392_vm0, %v351_v22 }
  0x25   : > { %2599 = vmatprep.mubr.msk.bf16.mxu0 %vm392_vm0, %v352_v23  ;;  %2676 = vmatpush3.bf16.msra.mxu0 %v2910_v63 }
  0x26   : > { %2636 = vmatpush3.bf16.msra.mxu1 %v2901_v58  ;;  %2677 = vmatprep.subr.bf16.mxu0 %v2912_v0 }
  0x27   : > { %2637 = vmatprep.subr.bf16.mxu1 %v2902_v59 }
  0x29   : > { %2678 = vmatpush3.bf16.msra.mxu0 %v2912_v0 }
  0x2a   : > { %2638 = vmatpush3.bf16.msra.mxu1 %v2902_v59  ;;  %2679 = vmatprep.subr.bf16.mxu0 %v2914_v1 }
  0x2b   : > { %2719 = vmatprep.subr.bf16.mxu1 %v2903_v60 }
  0x2c   : > { %2600 = vmatmul.mubr.msk.bf16.gmra.mxu0 %vm392_vm0, %v353_v28 }
  0x2d   : > { %2603 = vmatprep.mubr.msk.bf16.mxu0 %vm392_vm0, %v354_v29  ;;  %2680 = vmatpush3.bf16.msra.mxu0 %v2914_v1  ;;  %v2913_v1 = vld [vmem:[%s4068_s2 + $0xc8] sm:$0xff]  }
  0x34   : > { %2604 = vmatmul.mubr.msk.bf16.gmra.mxu0 %vm392_vm0, %v355_v34 }
  0x35   : > { %2607 = vmatprep.mubr.msk.bf16.mxu0 %vm392_vm0, %v356_v35 }
  0x3c   : > { %2608 = vmatmul.mubr.msk.bf16.gmra.mxu0 %vm392_vm0, %v357_v40 }
  0x3d   : > { %2611 = vmatprep.mubr.msk.bf16.mxu0 %vm392_vm0, %v358_v41  ;;  %v2907_v41 = vld [vmem:[%s4068_s2 + $0xe0] sm:$0xff]  }
  0x44   : > { %2612 = vmatmul.mubr.msk.bf16.gmra.mxu0 %vm392_vm0, %v359_v46 }
  0x45   : > { %2615 = vmatprep.mubr.msk.bf16.mxu0 %vm392_vm0, %v360_v47 }
  0x4c   : > { %2616 = vmatmul.mubr.msk.bf16.gmra.mxu0 %vm392_vm0, %v361_v52 }
  0x4d   : > { %2619 = vmatprep.mubr.msk.bf16.mxu0 %vm392_vm0, %v362_v53 }
  0x54   : > { %2620 = vmatmul.mubr.msk.bf16.gmra.mxu0 %vm392_vm0, %v363_v56 }
  0xdc   : > { %v2593_v7 = vpop.f32.mrf.mxu0 }
  0xdd   : > { %v484_v13 = vadd.f32 %v2593_v7, %v3192_v8 }
  0xde   : > { %v475_v9 = vpop.f32.mrf.mxu0 }
  0xdf   : > { %v476_v11 = vadd.f32 %v475_v9, %v3192_v8  ;;  %v604_v20 = vmax.f32 %v484_v13, 0.0 }
  0xe0   : > { %v2594_v10 = vpop.f32.mrf.mxu0 }
  0xe1   : > { %v487_v12 = vadd.f32 %v2594_v10, %v3192_v8  ;;  %v602_v18 = vmax.f32 %v476_v11, 0.0 }
  0xe2   : > { %v478_v14 = vpop.f32.mrf.mxu0 }
  0xe3   : > { %v479_v15 = vadd.f32 %v478_v14, %v3192_v8  ;;  %v605_v16 = vmax.f32 %v487_v12, 0.0 }
  0xe4   : > { %v2597_v17 = vpop.f32.mrf.mxu0 }
  0xe5   : > { %v603_v19 = vmax.f32 %v479_v15, 0.0  ;;  %v635_v23 = vpack.c.bf16 %v605_v16, %v604_v20  ;;  %v500_v28 = vadd.f32 %v2597_v17, %v3192_v8 }
  0xe6   : > { %v491_v21 = vpop.f32.mrf.mxu0 }
  0xe7   : > { %v634_v22 = vpack.c.bf16 %v603_v19, %v602_v18  ;;  %v492_v26 = vadd.f32 %v491_v21, %v3192_v8  ;;  %v608_v36 = vmax.f32 %v500_v28, 0.0 }
  0xe8   : > { %v2598_v24 = vpop.f32.mrf.mxu0 }
  0xe9   : > { %v503_v27 = vadd.f32 %v2598_v24, %v3192_v8  ;;  %2639 = vmatprep.mubr.bf16.mxu1 %v634_v22  ;;  %v606_v34 = vmax.f32 %v492_v26, 0.0 }
  0xea   : > { %v494_v29 = vpop.f32.mrf.mxu0  ;;  %2640 = vmatmul.mubr.bf16.vlgmr.msra.gmra.mxu1 %v635_v23 }
  0xeb   : > { %v495_v30 = vadd.f32 %v494_v29, %v3192_v8  ;;  %2720 = vmatpush3.bf16.msra.mxu1 %v2903_v60  ;;  %v609_v31 = vmax.f32 %v503_v27, 0.0 }
  0xec   : > { %v2601_v32 = vpop.f32.mrf.mxu0  ;;  %2721 = vmatprep.subr.bf16.mxu1 %v2904_v25 }
  0xed   : > { %v607_v35 = vmax.f32 %v495_v30, 0.0  ;;  %v637_v39 = vpack.c.bf16 %v609_v31, %v608_v36  ;;  %v516_v44 = vadd.f32 %v2601_v32, %v3192_v8 }
  0xee   : > { %v507_v37 = vpop.f32.mrf.mxu0 }
  0xef   : > { %v636_v38 = vpack.c.bf16 %v607_v35, %v606_v34  ;;  %2722 = vmatpush3.bf16.msra.mxu1 %v2904_v25  ;;  %v508_v42 = vadd.f32 %v507_v37, %v3192_v8  ;;  %v612_v52 = vmax.f32 %v516_v44, 0.0 }
  0xf0   : > { %v2602_v40 = vpop.f32.mrf.mxu0  ;;  %2723 = vmatprep.subr.bf16.mxu1 %v2905_v33 }
  0xf1   : > { %v519_v43 = vadd.f32 %v2602_v40, %v3192_v8  ;;  %2643 = vmatprep.mubr.bf16.mxu1 %v636_v38  ;;  %v610_v50 = vmax.f32 %v508_v42, 0.0 }
  0xf2   : > { %v510_v45 = vpop.f32.mrf.mxu0  ;;  %2644 = vmatmul.mubr.bf16.gmra.mxu1 %v637_v39 }
  0xf3   : > { %v511_v46 = vadd.f32 %v510_v45, %v3192_v8  ;;  %2724 = vmatpush3.bf16.msra.mxu1 %v2905_v33  ;;  %v613_v47 = vmax.f32 %v519_v43, 0.0 }
  0xf4   : > { %v2605_v48 = vpop.f32.mrf.mxu0  ;;  %2725 = vmatprep.subr.bf16.mxu1 %v2907_v41 }
  0xf5   : > { %v611_v51 = vmax.f32 %v511_v46, 0.0  ;;  %v639_v55 = vpack.c.bf16 %v613_v47, %v612_v52  ;;  %v532_v60 = vadd.f32 %v2605_v48, %v3192_v8 }
  0xf6   : > { %v523_v53 = vpop.f32.mrf.mxu0 }
  0xf7   : > { %v638_v54 = vpack.c.bf16 %v611_v51, %v610_v50  ;;  %2726 = vmatpush3.bf16.msra.mxu1 %v2907_v41  ;;  %v524_v58 = vadd.f32 %v523_v53, %v3192_v8  ;;  %v616_v7 = vmax.f32 %v532_v60, 0.0 }
  0xf8   : > { %v2606_v56 = vpop.f32.mrf.mxu0  ;;  %2727 = vmatprep.subr.bf16.mxu1 %v2909_v49 }
  0xf9   : > { %v535_v59 = vadd.f32 %v2606_v56, %v3192_v8  ;;  %2647 = vmatprep.mubr.bf16.mxu1 %v638_v54  ;;  %v614_v4 = vmax.f32 %v524_v58, 0.0 }
  0xfa   : > { %v526_v61 = vpop.f32.mrf.mxu0  ;;  %2648 = vmatmul.mubr.bf16.gmra.mxu1 %v639_v55 }
  0xfb   : > { %v527_v62 = vadd.f32 %v526_v61, %v3192_v8  ;;  %2728 = vmatpush3.bf16.msra.mxu1 %v2909_v49  ;;  %v617_v63 = vmax.f32 %v535_v59, 0.0 }
  0xfc   : > { %v2609_v0 = vpop.f32.mrf.mxu0  ;;  %2729 = vmatprep.subr.bf16.mxu1 %v2911_v57 }
  0xfd   : > { %v615_v6 = vmax.f32 %v527_v62, 0.0  ;;  %v641_v11 = vpack.c.bf16 %v617_v63, %v616_v7  ;;  %v548_v15 = vadd.f32 %v2609_v0, %v3192_v8  ;;  %v2918_v7 = vld [vmem:[%s4068_s2 + $0x80] sm:$0xff]  }
  0xfe   : > { %v539_v9 = vpop.f32.mrf.mxu0 }
  0xff   : > { %v640_v10 = vpack.c.bf16 %v615_v6, %v614_v4  ;;  %2730 = vmatpush3.bf16.msra.mxu1 %v2911_v57  ;;  %v540_v13 = vadd.f32 %v539_v9, %v3192_v8  ;;  %v620_v22 = vmax.f32 %v548_v15, 0.0  ;;  %v2915_v4 = vld [vmem:[%s4068_s2 + $0x90] sm:$0xff]   ;;  %v2917_v6 = vld [vmem:[%s4068_s2 + $0x88] sm:$0xff]   ;;  %v2919_v9 = vld [vmem:[%s4068_s2 + $0x138] sm:$0xff]  }
 0x100   : > { %v2610_v12 = vpop.f32.mrf.mxu0  ;;  %2731 = vmatprep.subr.bf16.mxu1 %v2913_v1  ;;  %2681 = vmatprep.subr.bf16.mxu0 %v2915_v4 }
 0x101   : > { %v551_v14 = vadd.f32 %v2610_v12, %v3192_v8  ;;  %2651 = vmatprep.mubr.bf16.mxu1 %v640_v10  ;;  %v618_v20 = vmax.f32 %v540_v13, 0.0  ;;  %2682 = vmatpush3.bf16.msra.mxu0 %v2915_v4  ;;  %v652_v10 = vsub.s32 1, %v3183_v3 }
 0x102   : > { %v542_v16 = vpop.f32.mrf.mxu0  ;;  %2652 = vmatmul.mubr.bf16.gmra.mxu1 %v641_v11  ;;  %2683 = vmatprep.subr.bf16.mxu0 %v2917_v6 }
 0x103   : > { %v543_v17 = vadd.f32 %v542_v16, %v3192_v8  ;;  %2732 = vmatpush3.bf16.msra.mxu1 %v2913_v1  ;;  %v621_v18 = vmax.f32 %v551_v14, 0.0  ;;  %v3261_v13 = vrot.slane %v3188_v5, %v652_v10 }
 0x104   : > { %v2613_v19 = vpop.f32.mrf.mxu0 }
 0x105   : > { %v619_v21 = vmax.f32 %v543_v17, 0.0  ;;  %v643_v25 = vpack.c.bf16 %v621_v18, %v620_v22  ;;  %v564_v29 = vadd.f32 %v2613_v19, %v3192_v8  ;;  %2684 = vmatpush3.bf16.msra.mxu0 %v2917_v6 }
 0x106   : > { %v555_v23 = vpop.f32.mrf.mxu0  ;;  %2685 = vmatprep.subr.bf16.mxu0 %v2918_v7 }
 0x107   : > { %v642_v24 = vpack.c.bf16 %v619_v21, %v618_v20  ;;  %v556_v27 = vadd.f32 %v555_v23, %v3192_v8  ;;  %v624_v36 = vmax.f32 %v564_v29, 0.0 }
 0x108   : > { %v2614_v26 = vpop.f32.mrf.mxu0 }
 0x109   : > { %v567_v28 = vadd.f32 %v2614_v26, %v3192_v8  ;;  %2655 = vmatprep.mubr.bf16.mxu1 %v642_v24  ;;  %v622_v34 = vmax.f32 %v556_v27, 0.0  ;;  %2686 = vmatpush3.bf16.msra.mxu0 %v2918_v7  ;;  %v2920_v24 = vld [vmem:[%s4068_s2 + $0x130] sm:$0xff]  }
 0x10a   : > { %v558_v30 = vpop.f32.mrf.mxu0  ;;  %2656 = vmatmul.mubr.bf16.gmra.mxu1 %v643_v25  ;;  %2767 = vmatprep.subr.bf16.mxu0 %v2919_v9 }
 0x10b   : > { %v559_v31 = vadd.f32 %v558_v30, %v3192_v8  ;;  %v625_v32 = vmax.f32 %v567_v28, 0.0  ;;  %v2921_v28 = vld [vmem:[%s4068_s2 + $0x128] sm:$0xff]  }
 0x10c   : > { %v2617_v33 = vpop.f32.mrf.mxu0 }
 0x10d   : > { %v623_v35 = vmax.f32 %v559_v31, 0.0  ;;  %v645_v39 = vpack.c.bf16 %v625_v32, %v624_v36  ;;  %v580_v43 = vadd.f32 %v2617_v33, %v3192_v8  ;;  %v2922_v36 = vld [vmem:[%s4068_s2 + $0x120] sm:$0xff]  }
 0x10e   : > { %v571_v37 = vpop.f32.mrf.mxu0 }
 0x10f   : > { %v644_v38 = vpack.c.bf16 %v623_v35, %v622_v34  ;;  %v572_v41 = vadd.f32 %v571_v37, %v3192_v8  ;;  %v628_v50 = vmax.f32 %v580_v43, 0.0 }
 0x110   : > { %v2618_v40 = vpop.f32.mrf.mxu0 }
 0x111   : > { %v583_v42 = vadd.f32 %v2618_v40, %v3192_v8  ;;  %2659 = vmatprep.mubr.bf16.mxu1 %v644_v38  ;;  %v626_v48 = vmax.f32 %v572_v41, 0.0 }
 0x112   : > { %v574_v44 = vpop.f32.mrf.mxu0  ;;  %2660 = vmatmul.mubr.bf16.gmra.mxu1 %v645_v39 }
 0x113   : > { %v575_v45 = vadd.f32 %v574_v44, %v3192_v8  ;;  %v629_v46 = vmax.f32 %v583_v42, 0.0 }
 0x114   : > { %v2621_v47 = vpop.f32.mrf.mxu0 }
 0x115   : > { %v627_v49 = vmax.f32 %v575_v45, 0.0  ;;  %v647_v53 = vpack.c.bf16 %v629_v46, %v628_v50  ;;  %v596_v57 = vadd.f32 %v2621_v47, %v3192_v8 }
 0x116   : > { %v587_v51 = vpop.f32.mrf.mxu0 }
 0x117   : > { %v646_v52 = vpack.c.bf16 %v627_v49, %v626_v48  ;;  %v588_v55 = vadd.f32 %v587_v51, %v3192_v8  ;;  %v632_v63 = vmax.f32 %v596_v57, 0.0 }
 0x118   : > { %v2622_v54 = vpop.f32.mrf.mxu0 }
 0x119   : > { %v599_v56 = vadd.f32 %v2622_v54, %v3192_v8  ;;  %2663 = vmatprep.mubr.bf16.mxu1 %v646_v52  ;;  %v630_v61 = vmax.f32 %v588_v55, 0.0 }
 0x11a   : > { %v590_v58 = vpop.f32.mrf.mxu0  ;;  %2664 = vmatmul.mubr.bf16.gmra.mxu1 %v647_v53 }
 0x11b   : > { %v591_v59 = vadd.f32 %v590_v58, %v3192_v8  ;;  %v633_v60 = vmax.f32 %v599_v56, 0.0  ;;  %v2916_v8 = vld [vmem:[%s4068_s2 + $0xc0] sm:$0xff]  }
 0x11c   : > { %2733 = vmatprep.subr.bf16.mxu1 %v2916_v8 }
 0x11d   : > { %v631_v62 = vmax.f32 %v591_v59, 0.0  ;;  %v649_v1 = vpack.c.bf16 %v633_v60, %v632_v63  ;;  %2734 = vmatpush3.bf16.msra.mxu1 %v2916_v8 }
 0x11f   : > { %v648_v0 = vpack.c.bf16 %v631_v62, %v630_v61 }
 0x121   : > { %2667 = vmatprep.mubr.bf16.mxu1 %v648_v0 }
 0x122   : > { %2668 = vmatmul.mubr.bf16.gmra.mxu1 %v649_v1 }
 0x1aa   : > { %v2641_v11 = vpop.f32.mrf.mxu1 }
 0x1ab   : > { %v745_v19 = vadd.f32 %v2641_v11, %v3261_v13 }
 0x1ac   : > { %v736_v12 = vpop.f32.mrf.mxu1 }
 0x1ad   : > { %v737_v17 = vadd.f32 %v736_v12, %v3261_v13 }
 0x1ae   : > { %v2642_v14 = vpop.f32.mrf.mxu1 }
 0x1af   : > { %v748_v15 = vadd.f32 %v2642_v14, %v3261_v13 }
 0x1b0   : > { %v739_v16 = vpop.f32.mrf.mxu1 }
 0x1b1   : > { %v740_v18 = vadd.f32 %v739_v16, %v3261_v13  ;;  %v864_v22 = vpack.c.bf16 %v748_v15, %v745_v19 }
 0x1b2   : > { %v2645_v20 = vpop.f32.mrf.mxu1 }
 0x1b3   : > { %v863_v21 = vpack.c.bf16 %v740_v18, %v737_v17  ;;  %v761_v31 = vadd.f32 %v2645_v20, %v3261_v13 }
 0x1b4   : > { %v752_v23 = vpop.f32.mrf.mxu1 }
 0x1b5   : > { %2687 = vmatprep.mubr.bf16.mxu0 %v863_v21  ;;  %2735 = vmatprep.mubr.bf16.mxu1 %v863_v21  ;;  %v753_v29 = vadd.f32 %v752_v23, %v3261_v13 }
 0x1b6   : > { %v2646_v25 = vpop.f32.mrf.mxu1  ;;  %2688 = vmatmul.mubr.bf16.vlgmr.msra.gmra.mxu0 %v864_v22  ;;  %2736 = vmatmul.mubr.bf16.vlgmr.msra.gmra.mxu1 %v864_v22 }
 0x1b7   : > { %2768 = vmatpush3.bf16.msra.mxu0 %v2919_v9  ;;  %v764_v26 = vadd.f32 %v2646_v25, %v3261_v13 }
 0x1b8   : > { %v755_v27 = vpop.f32.mrf.mxu1  ;;  %2769 = vmatprep.subr.bf16.mxu0 %v2920_v24 }
 0x1b9   : > { %v756_v30 = vadd.f32 %v755_v27, %v3261_v13  ;;  %v866_v34 = vpack.c.bf16 %v764_v26, %v761_v31 }
 0x1ba   : > { %v2649_v32 = vpop.f32.mrf.mxu1 }
 0x1bb   : > { %v865_v33 = vpack.c.bf16 %v756_v30, %v753_v29  ;;  %2770 = vmatpush3.bf16.msra.mxu0 %v2920_v24  ;;  %v777_v42 = vadd.f32 %v2649_v32, %v3261_v13 }
 0x1bc   : > { %v768_v35 = vpop.f32.mrf.mxu1  ;;  %2771 = vmatprep.subr.bf16.mxu0 %v2921_v28 }
 0x1bd   : > { %2691 = vmatprep.mubr.bf16.mxu0 %v865_v33  ;;  %2739 = vmatprep.mubr.bf16.mxu1 %v865_v33  ;;  %v769_v40 = vadd.f32 %v768_v35, %v3261_v13  ;;  %v2923_v35 = vld [vmem:[%s4068_s2 + $0x118] sm:$0xff]  }
 0x1be   : > { %v2650_v37 = vpop.f32.mrf.mxu1  ;;  %2692 = vmatmul.mubr.bf16.gmra.mxu0 %v866_v34  ;;  %2740 = vmatmul.mubr.bf16.gmra.mxu1 %v866_v34 }
 0x1bf   : > { %2772 = vmatpush3.bf16.msra.mxu0 %v2921_v28  ;;  %v780_v38 = vadd.f32 %v2650_v37, %v3261_v13  ;;  %v2926_v37 = vld [vmem:[%s4068_s2 + $0x100] sm:$0xff]  }
 0x1c0   : > { %v771_v39 = vpop.f32.mrf.mxu1  ;;  %2773 = vmatprep.subr.bf16.mxu0 %v2922_v36 }
 0x1c1   : > { %v772_v41 = vadd.f32 %v771_v39, %v3261_v13  ;;  %v868_v45 = vpack.c.bf16 %v780_v38, %v777_v42  ;;  %v1094_v38 = vsub.s32 3, %v3183_v3 }
 0x1c2   : > { %v2653_v43 = vpop.f32.mrf.mxu1 }
 0x1c3   : > { %v867_v44 = vpack.c.bf16 %v772_v41, %v769_v40  ;;  %2774 = vmatpush3.bf16.msra.mxu0 %v2922_v36  ;;  %v793_v52 = vadd.f32 %v2653_v43, %v3261_v13  ;;  %v2924_v36 = vld [vmem:[%s4068_s2 + $0x110] sm:$0xff]   ;;  %v3318_v39 = vrot.slane %v3188_v5, %v1094_v38  ;;  %v881_v40 = vsub.s32 2, %v3183_v3  ;;  %v3324_v41 = vld [vmem:[%s4068_s2 + $0x178] sm:$0xff]  }
 0x1c4   : > { %v784_v46 = vpop.f32.mrf.mxu1  ;;  %2775 = vmatprep.subr.bf16.mxu0 %v2923_v35  ;;  %2863 = vmatprep.subr.bf16.mxu1 %v3324_v41 }
 0x1c5   : > { %2695 = vmatprep.mubr.bf16.mxu0 %v867_v44  ;;  %2743 = vmatprep.mubr.bf16.mxu1 %v867_v44  ;;  %v785_v50 = vadd.f32 %v784_v46, %v3261_v13 }
 0x1c6   : > { %v2654_v47 = vpop.f32.mrf.mxu1  ;;  %2696 = vmatmul.mubr.bf16.gmra.mxu0 %v868_v45  ;;  %2744 = vmatmul.mubr.bf16.gmra.mxu1 %v868_v45  ;;  %v3334_v45 = vld [vmem:[%s4068_s2 + $0x170] sm:$0xff]  }
 0x1c7   : > { %v796_v48 = vadd.f32 %v2654_v47, %v3261_v13  ;;  %2776 = vmatpush3.bf16.msra.mxu0 %v2923_v35  ;;  %2871 = vmatpush3.bf16.msra.mxu1 %v3324_v41 }
 0x1c8   : > { %v787_v49 = vpop.f32.mrf.mxu1  ;;  %2777 = vmatprep.subr.bf16.mxu0 %v2924_v36  ;;  %2864 = vmatprep.subr.bf16.mxu1 %v3334_v45 }
 0x1c9   : > { %v788_v51 = vadd.f32 %v787_v49, %v3261_v13  ;;  %v870_v55 = vpack.c.bf16 %v796_v48, %v793_v52  ;;  %v3338_v48 = vrot.slane %v3188_v5, %v881_v40 }
 0x1ca   : > { %v2657_v53 = vpop.f32.mrf.mxu1 }
 0x1cb   : > { %v869_v54 = vpack.c.bf16 %v788_v51, %v785_v50  ;;  %v809_v62 = vadd.f32 %v2657_v53, %v3261_v13  ;;  %2778 = vmatpush3.bf16.msra.mxu0 %v2924_v36  ;;  %2872 = vmatpush3.bf16.msra.mxu1 %v3334_v45 }
 0x1cc   : > { %v800_v56 = vpop.f32.mrf.mxu1 }
 0x1cd   : > { %2699 = vmatprep.mubr.bf16.mxu0 %v869_v54  ;;  %2747 = vmatprep.mubr.bf16.mxu1 %v869_v54  ;;  %v801_v60 = vadd.f32 %v800_v56, %v3261_v13  ;;  %v3348_v54 = vld [vmem:[%s4068_s2 + $0x168] sm:$0xff]  }
 0x1ce   : > { %v2658_v57 = vpop.f32.mrf.mxu1  ;;  %2700 = vmatmul.mubr.bf16.gmra.mxu0 %v870_v55  ;;  %2748 = vmatmul.mubr.bf16.gmra.mxu1 %v870_v55 }
 0x1cf   : > { %v812_v58 = vadd.f32 %v2658_v57, %v3261_v13  ;;  %2865 = vmatprep.subr.bf16.mxu1 %v3348_v54 }
 0x1d0   : > { %v803_v59 = vpop.f32.mrf.mxu1  ;;  %2873 = vmatpush3.bf16.msra.mxu1 %v3348_v54 }
 0x1d1   : > { %v804_v61 = vadd.f32 %v803_v59, %v3261_v13  ;;  %v872_v1 = vpack.c.bf16 %v812_v58, %v809_v62 }
 0x1d2   : > { %v2661_v63 = vpop.f32.mrf.mxu1 }
 0x1d3   : > { %v871_v0 = vpack.c.bf16 %v804_v61, %v801_v60  ;;  %v825_v11 = vadd.f32 %v2661_v63, %v3261_v13 }
 0x1d4   : > { %v816_v4 = vpop.f32.mrf.mxu1 }
 0x1d5   : > { %2703 = vmatprep.mubr.bf16.mxu0 %v871_v0  ;;  %2751 = vmatprep.mubr.bf16.mxu1 %v871_v0  ;;  %v817_v9 = vadd.f32 %v816_v4, %v3261_v13  ;;  %v3367_v4 = vld [vmem:[%s4068_s2 + $0x160] sm:$0xff]  }
 0x1d6   : > { %v2662_v6 = vpop.f32.mrf.mxu1  ;;  %2704 = vmatmul.mubr.bf16.gmra.mxu0 %v872_v1  ;;  %2752 = vmatmul.mubr.bf16.gmra.mxu1 %v872_v1 }
 0x1d7   : > { %v828_v8 = vadd.f32 %v2662_v6, %v3261_v13  ;;  %2866 = vmatprep.subr.bf16.mxu1 %v3367_v4 }
 0x1d8   : > { %v819_v7 = vpop.f32.mrf.mxu1  ;;  %2874 = vmatpush3.bf16.msra.mxu1 %v3367_v4 }
 0x1d9   : > { %v820_v10 = vadd.f32 %v819_v7, %v3261_v13  ;;  %v874_v15 = vpack.c.bf16 %v828_v8, %v825_v11 }
 0x1da   : > { %v2665_v12 = vpop.f32.mrf.mxu1 }
 0x1db   : > { %v873_v14 = vpack.c.bf16 %v820_v10, %v817_v9  ;;  %v841_v22 = vadd.f32 %v2665_v12, %v3261_v13 }
 0x1dc   : > { %v832_v16 = vpop.f32.mrf.mxu1 }
 0x1dd   : > { %2707 = vmatprep.mubr.bf16.mxu0 %v873_v14  ;;  %2755 = vmatprep.mubr.bf16.mxu1 %v873_v14  ;;  %v833_v20 = vadd.f32 %v832_v16, %v3261_v13 }
 0x1de   : > { %v2666_v17 = vpop.f32.mrf.mxu1  ;;  %2708 = vmatmul.mubr.bf16.gmra.mxu0 %v874_v15  ;;  %2756 = vmatmul.mubr.bf16.gmra.mxu1 %v874_v15 }
 0x1df   : > { %v844_v18 = vadd.f32 %v2666_v17, %v3261_v13 }
 0x1e0   : > { %v835_v19 = vpop.f32.mrf.mxu1 }
 0x1e1   : > { %v836_v21 = vadd.f32 %v835_v19, %v3261_v13  ;;  %v876_v25 = vpack.c.bf16 %v844_v18, %v841_v22 }
 0x1e2   : > { %v2669_v23 = vpop.f32.mrf.mxu1 }
 0x1e3   : > { %v875_v24 = vpack.c.bf16 %v836_v21, %v833_v20  ;;  %v857_v32 = vadd.f32 %v2669_v23, %v3261_v13  ;;  %v3399_v23 = vld [vmem:[%s4068_s2 + $0x158] sm:$0xff]  }
 0x1e4   : > { %v848_v26 = vpop.f32.mrf.mxu1  ;;  %2867 = vmatprep.subr.bf16.mxu1 %v3399_v23 }
 0x1e5   : > { %2711 = vmatprep.mubr.bf16.mxu0 %v875_v24  ;;  %2759 = vmatprep.mubr.bf16.mxu1 %v875_v24  ;;  %v849_v30 = vadd.f32 %v848_v26, %v3261_v13 }
 0x1e6   : > { %v2670_v27 = vpop.f32.mrf.mxu1  ;;  %2712 = vmatmul.mubr.bf16.gmra.mxu0 %v876_v25  ;;  %2760 = vmatmul.mubr.bf16.gmra.mxu1 %v876_v25 }
 0x1e7   : > { %v860_v28 = vadd.f32 %v2670_v27, %v3261_v13  ;;  %2875 = vmatpush3.bf16.msra.mxu1 %v3399_v23 }
 0x1e8   : > { %v851_v29 = vpop.f32.mrf.mxu1 }
 0x1e9   : > { %v852_v31 = vadd.f32 %v851_v29, %v3261_v13  ;;  %v878_v34 = vpack.c.bf16 %v860_v28, %v857_v32  ;;  %v2925_v13 = vld [vmem:[%s4068_s2 + $0x108] sm:$0xff]  }
 0x1ea   : > { %2779 = vmatprep.subr.bf16.mxu0 %v2925_v13 }
 0x1eb   : > { %v877_v33 = vpack.c.bf16 %v852_v31, %v849_v30  ;;  %2780 = vmatpush3.bf16.msra.mxu0 %v2925_v13 }
 0x1ec   : > { %2781 = vmatprep.subr.bf16.mxu0 %v2926_v37 }
 0x1ed   : > { %2715 = vmatprep.mubr.bf16.mxu0 %v877_v33  ;;  %2763 = vmatprep.mubr.bf16.mxu1 %v877_v33 }
 0x1ee   : > { %2716 = vmatmul.mubr.bf16.gmra.mxu0 %v878_v34  ;;  %2764 = vmatmul.mubr.bf16.gmra.mxu1 %v878_v34 }
 0x1ef   : > { %2782 = vmatpush3.bf16.msra.mxu0 %v2926_v37 }
 0x1f0   : > { %2815 = vmatprep.subr.bf16.mxu0 %v3324_v41 }
 0x276   : > { %v2689_v42 = vpop.f32.mrf.mxu0  ;;  %v2737_v43 = vpop.f32.mrf.mxu1 }
 0x277   : > { %v3327_v44 = vadd.f32 %v2737_v43, %v3318_v39  ;;  %v3356_v59 = vadd.f32 %v2689_v42, %v3338_v48 }
 0x278   : > { %v965_v46 = vpop.f32.mrf.mxu0  ;;  %v1178_v47 = vpop.f32.mrf.mxu1 }
 0x279   : > { %v1307_v49 = vmul.f32 0.5, %v3327_v44  ;;  %v3343_v50 = vadd.f32 %v1178_v47, %v3318_v39  ;;  %v3370_v6 = vadd.f32 %v965_v46, %v3338_v48  ;;  %v2021_v11 = vmul.f32 %v3356_v59, %v3356_v59  ;;  %v3429_v46 = vld [vmem:[%s4068_s2 + $0x150] sm:$0xff]  }
 0x27a   : > { %v2690_v51 = vpop.f32.mrf.mxu0  ;;  %v2738_v52 = vpop.f32.mrf.mxu1  ;;  %v1989_v20 = vsub.f32 -1.0, %v3327_v44  ;;  %4085 = vst [vmem:[#allocation4_spill] sm:$0xff] %v3429_v46  ;;  %2868 = vmatprep.subr.bf16.mxu1 %v3429_v46 }
 0x27b   : > { %v1341_v53 = vmul.f32 1.442695, %v1307_v49  ;;  %v1305_v55 = vmul.f32 0.5, %v3343_v50  ;;  %v3352_v56 = vadd.f32 %v2738_v52, %v3318_v39  ;;  %v3379_v12 = vadd.f32 %v2690_v51, %v3338_v48  ;;  %2876 = vmatpush3.bf16.msra.mxu1 %v3429_v46 }
 0x27c   : > { %v968_v57 = vpop.f32.mrf.mxu0  ;;  %v1181_v58 = vpop.f32.mrf.mxu1  ;;  %v2019_v24 = vmul.f32 %v3370_v6, %v3370_v6  ;;  %v1987_v25 = vsub.f32 -1.0, %v3343_v50 }
 0x27d   : > { %v3359_v60 = vadd.f32 %v1181_v58, %v3318_v39  ;;  %v1337_v61 = vmul.f32 1.442695, %v1305_v55  ;;  %v1308_v62 = vmul.f32 0.5, %v3352_v56  ;;  %2935 = vpow2.f32 %v1341_v53 }
 0x27e   : > { %v2693_v63 = vpop.f32.mrf.mxu0  ;;  %v2741_v0 = vpop.f32.mrf.mxu1  ;;  %v3383_v15 = vadd.f32 %v968_v57, %v3338_v48  ;;  %v2022_v30 = vmul.f32 %v3379_v12, %v3379_v12  ;;  %v1990_v34 = vsub.f32 -1.0, %v3352_v56 }
 0x27f   : > { %v1306_v1 = vmul.f32 0.5, %v3359_v60  ;;  %2937 = vpow2.f32 %v1337_v61  ;;  %v1343_v8 = vmul.f32 1.442695, %v1308_v62  ;;  %v3373_v7 = vadd.f32 %v2741_v0, %v3318_v39 }
 0x280   : > { %v981_v9 = vpop.f32.mrf.mxu0  ;;  %v1194_v10 = vpop.f32.mrf.mxu1  ;;  %v3391_v21 = vadd.f32 %v2693_v63, %v3338_v48  ;;  %v2020_v35 = vmul.f32 %v3383_v15, %v3383_v15  ;;  %v1988_v40 = vsub.f32 -1.0, %v3359_v60  ;;  %v2053_v63 = vadd.f32 %v2021_v11, %v1989_v20 }
 0x281   : > { %v1339_v14 = vmul.f32 1.442695, %v1306_v1  ;;  %2939 = vpow2.f32 %v1343_v8  ;;  %v1311_v16 = vmul.f32 0.5, %v3373_v7  ;;  %v3387_v17 = vadd.f32 %v1194_v10, %v3318_v39  ;;  %v3454_v8 = vld [vmem:[%s4068_s2 + $0x148] sm:$0xff]  }
 0x282   : > { %v2694_v18 = vpop.f32.mrf.mxu0  ;;  %v2742_v19 = vpop.f32.mrf.mxu1  ;;  %v3405_v26 = vadd.f32 %v981_v9, %v3338_v48  ;;  %v2025_v42 = vmul.f32 %v3391_v21, %v3391_v21  ;;  %v1993_v43 = vsub.f32 -1.0, %v3373_v7  ;;  %4086 = vst [vmem:[#allocation5_spill] sm:$0xff] %v3454_v8  ;;  %v2051_v9 = vadd.f32 %v2019_v24, %v1987_v25  ;;  %2869 = vmatprep.subr.bf16.mxu1 %v3454_v8 }
 0x283   : > { %2941 = vpow2.f32 %v1339_v14  ;;  %v3394_v22 = vadd.f32 %v2742_v19, %v3318_v39  ;;  %v1309_v27 = vmul.f32 0.5, %v3387_v17  ;;  %v1349_v31 = vmul.f32 1.442695, %v1311_v16  ;;  %2877 = vmatpush3.bf16.msra.mxu1 %v3454_v8 }
 0x284   : > { %v984_v28 = vpop.f32.mrf.mxu0  ;;  %v1197_v29 = vpop.f32.mrf.mxu1  ;;  %v3412_v32 = vadd.f32 %v2694_v18, %v3338_v48  ;;  %v2023_v47 = vmul.f32 %v3405_v26, %v3405_v26  ;;  %v1991_v53 = vsub.f32 -1.0, %v3387_v17  ;;  %v2054_v10 = vadd.f32 %v2022_v30, %v1990_v34 }
 0x285   : > { %v1312_v33 = vmul.f32 0.5, %v3394_v22  ;;  %v1345_v36 = vmul.f32 1.442695, %v1309_v27  ;;  %v3420_v13 = vadd.f32 %v1197_v29, %v3318_v39  ;;  %v1994_v57 = vsub.f32 -1.0, %v3394_v22 }
 0x286   : > { %v2697_v37 = vpop.f32.mrf.mxu0  ;;  %v2745_v38 = vpop.f32.mrf.mxu1  ;;  %v2026_v55 = vmul.f32 %v3412_v32, %v3412_v32  ;;  %v3448_v0 = vadd.f32 %v984_v28, %v3338_v48  ;;  %v2052_v18 = vadd.f32 %v2020_v35, %v1988_v40  ;;  %v3470_v25 = vadd.f32 %v2025_v42, %v1993_v43 }
 0x287   : > { %v1351_v44 = vmul.f32 1.442695, %v1312_v33  ;;  %2943 = vpow2.f32 %v1345_v36  ;;  %v1310_v49 = vmul.f32 0.5, %v3420_v13  ;;  %v3435_v50 = vadd.f32 %v2745_v38, %v3318_v39 }
 0x288   : > { %v997_v51 = vpop.f32.mrf.mxu0  ;;  %v1210_v52 = vpop.f32.mrf.mxu1  ;;  %2945 = vpow2.f32 %v1349_v31  ;;  %v3459_v14 = vadd.f32 %v2697_v37, %v3338_v48  ;;  %v2055_v27 = vadd.f32 %v2023_v47, %v1991_v53  ;;  %v3472_v28 = vadd.f32 %v2026_v55, %v1994_v57 }
 0x289   : > { %v3442_v56 = vadd.f32 %v1210_v52, %v3318_v39  ;;  %2947 = vpow2.f32 %v1351_v44  ;;  %v1347_v58 = vmul.f32 1.442695, %v1310_v49  ;;  %v1315_v60 = vmul.f32 0.5, %v3435_v50 }
 0x28a   : > { %v2698_v61 = vpop.f32.mrf.mxu0  ;;  %v2746_v62 = vpop.f32.mrf.mxu1  ;;  %4087 = vst [vmem:[#allocation6_spill] sm:$0xff] %v3459_v14  ;;  %v2024_v33 = vmul.f32 %v3448_v0, %v3448_v0  ;;  %v1992_v38 = vsub.f32 -1.0, %v3420_v13  ;;  %v2029_v40 = vmul.f32 %v3459_v14, %v3459_v14  ;;  %v3490_v42 = vadd.f32 %v997_v51, %v3338_v48  ;;  %v226_v14 = vld [vmem:[%s3564_s19] sm:$0xff] }
 0x28b   : > { %v1313_v1 = vmul.f32 0.5, %v3442_v56  ;;  %v3456_v7 = vpop.eup %2935  ;;  %2949 = vpow2.f32 %v1347_v58  ;;  %v1357_v19 = vmul.f32 1.442695, %v1315_v60  ;;  %v3465_v22 = vadd.f32 %v2746_v62, %v3318_v39 }
 0x28c   : > { %v1000_v16 = vpop.f32.mrf.mxu0  ;;  %v1213_v11 = vpop.f32.mrf.mxu1  ;;  %v2085_v37 = vmul.f32 %v3456_v7, %v3456_v7  ;;  %v1997_v13 = vsub.f32 -1.0, %v3435_v50  ;;  %v3498_v55 = vadd.f32 %v2698_v61, %v3338_v48 }
 0x28d   : > { %v3462_v17 = vpop.eup %2937  ;;  %v1353_v20 = vmul.f32 1.442695, %v1313_v1  ;;  %v1316_v34 = vmul.f32 0.5, %v3465_v22  ;;  %v3480_v35 = vadd.f32 %v1213_v11, %v3318_v39  ;;  %v2056_v1 = vadd.f32 %v2024_v33, %v1992_v38 }
 0x28e   : > { %v2083_v24 = vmul.f32 %v3462_v17, %v3462_v17  ;;  %v2701_v29 = vpop.f32.mrf.mxu0  ;;  %v2749_v30 = vpop.f32.mrf.mxu1  ;;  %4088 = vst [vmem:[#allocation7_spill] sm:$0xff] %v3498_v55  ;;  %v2027_v11 = vmul.f32 %v3490_v42, %v3490_v42  ;;  %v3509_v50 = vadd.f32 %v1000_v16, %v3338_v48  ;;  %v3520_v38 = vadd.f32 %v2029_v40, %v1997_v13 }
 0x28f   : > { %v3474_v31 = vpop.eup %2939  ;;  %2951 = vpow2.f32 %v1353_v20  ;;  %v1359_v47 = vmul.f32 1.442695, %v1316_v34  ;;  %v1314_v49 = vmul.f32 0.5, %v3480_v35  ;;  %v3501_v51 = vadd.f32 %v2749_v30, %v3318_v39 }
 0x290   : > { %v3482_v36 = vpop.eup %2941  ;;  %v1226_v43 = vpop.f32.mrf.mxu1  ;;  %2953 = vpow2.f32 %v1357_v19  ;;  %v2115_v53 = vadd.f32 %v2083_v24, %v2051_v9  ;;  %v2086_v58 = vmul.f32 %v3474_v31, %v3474_v31  ;;  %v1995_v9 = vsub.f32 -1.0, %v3442_v56  ;;  %4089 = vst [vmem:[#allocation8_spill] sm:$0xff] %v3509_v50 }
 0x291   : > { %v2084_v44 = vmul.f32 %v3482_v36, %v3482_v36  ;;  %v1013_v52 = vpop.f32.mrf.mxu0  ;;  %2955 = vpow2.f32 %v1359_v47  ;;  %v1355_v62 = vmul.f32 1.442695, %v1314_v49  ;;  %v2117_v20 = vadd.f32 %v2085_v37, %v2053_v63 }
 0x292   : > { %v2750_v57 = vpop.f32.mrf.mxu1  ;;  %v3514_v30 = vadd.f32 %v1226_v43, %v3318_v39  ;;  %v2030_v56 = vmul.f32 %v3498_v55, %v3498_v55  ;;  %v1319_v16 = vmul.f32 0.5, %v3501_v51  ;;  %v2118_v37 = vadd.f32 %v2086_v58, %v2054_v10 }
 0x293   : > { %v2116_v60 = vadd.f32 %v2084_v44, %v2052_v18  ;;  %2957 = vpow2.f32 %v1355_v62  ;;  %v2702_v18 = vpop.f32.mrf.mxu0  ;;  %v1998_v43 = vsub.f32 -1.0, %v3465_v22  ;;  %v1996_v40 = vsub.f32 -1.0, %v3480_v35 }
 0x294   : > { %v1229_v61 = vpop.f32.mrf.mxu1  ;;  %v3511_v19 = vpop.eup %2943  ;;  %v1317_v49 = vmul.f32 0.5, %v3514_v30  ;;  %v3533_v13 = vadd.f32 %v2701_v29, %v3338_v48  ;;  %v3543_v58 = vadd.f32 %v1013_v52, %v3338_v48  ;;  %v1365_v5 = vmul.f32 1.442695, %v1319_v16 }
 0x295   : > { %v2147_v24 = vadd.f32 %v2116_v60, %v2115_v53  ;;  %v3516_v34 = vpop.eup %2945  ;;  %v2087_v33 = vmul.f32 %v3511_v19, %v3511_v19  ;;  %v2028_v53 = vmul.f32 %v3509_v50, %v3509_v50  ;;  %v3536_v60 = vadd.f32 %v2750_v57, %v3318_v39  ;;  %v227_v50 = vld [vmem:[%s3564_s19 + $0x8] sm:$0xff] }
 0x296   : > { %v2753_v44 = vpop.f32.mrf.mxu1  ;;  %v3525_v63 = vpop.eup %2947  ;;  %4090 = vst [vmem:[#allocation9_spill] sm:$0xff] %v3533_v13  ;;  %v2089_v35 = vmul.f32 %v3516_v34, %v3516_v34 }
 0x297   : > { %v2148_v47 = vadd.f32 %v2147_v24, %v2117_v20  ;;  %v2119_v10 = vadd.f32 %v2087_v33, %v2055_v27  ;;  %v1361_v20 = vmul.f32 1.442695, %v1317_v49  ;;  %v1016_v24 = vpop.f32.mrf.mxu0  ;;  %v2090_v29 = vmul.f32 %v3525_v63, %v3525_v63 }
 0x298   : > { %v3538_v62 = vpop.f32.mrf.mxu1  ;;  %v3540_v2 = vpop.eup %2949  ;;  %v1320_v27 = vmul.f32 0.5, %v3536_v60  ;;  %v3553_v33 = vadd.f32 %v1229_v61, %v3318_v39  ;;  %v2062_v49 = vadd.f32 %v2030_v56, %v1998_v43  ;;  %v2060_v61 = vadd.f32 %v2028_v53, %v1996_v40 }
 0x299   : > { %v2149_v22 = vadd.f32 %v2148_v47, %v2118_v37  ;;  %v2088_v57 = vmul.f32 %v3540_v2, %v3540_v2  ;;  %2959 = vpow2.f32 %v1361_v20  ;;  %v2059_v47 = vadd.f32 %v2027_v11, %v1995_v9  ;;  %v2705_v55 = vpop.f32.mrf.mxu0 }
 0x29a   : > { %v3555_v52 = vpop.f32.mrf.mxu1  ;;  %v3573_v20 = vmul.f32 %v3543_v58, %v3543_v58  ;;  %v1318_v8 = vmul.f32 0.5, %v3553_v33  ;;  %2961 = vpow2.f32 %v1365_v5  ;;  %v2122_v56 = vadd.f32 %v2090_v29, %v3472_v28 }
 0x29b   : > { %v2150_v3 = vadd.f32 %v2149_v22, %v2119_v10  ;;  %v2120_v16 = vadd.f32 %v2088_v57, %v2056_v1  ;;  %v3568_v10 = vmul.f32 %v3533_v13, %v3533_v13  ;;  %v2121_v1 = vadd.f32 %v2089_v35, %v3470_v25  ;;  %v1029_v35 = vpop.f32.mrf.mxu0 }
 0x29c   : > { %v3557_v37 = vpop.eup %2951  ;;  %v3585_v43 = vadd.f32 %v2702_v18, %v3338_v48  ;;  %v1367_v53 = vmul.f32 1.442695, %v1320_v27  ;;  %v1363_v40 = vmul.f32 1.442695, %v1318_v8  ;;  %v1245_v57 = vpop.f32.mrf.mxu1  ;;  %v3590_v25 = vadd.f32 %v2753_v44, %v3318_v39 }
 0x29d   : > { %v3578_v46 = vpop.eup %2953  ;;  %v2151_v11 = vadd.f32 %v2150_v3, %v2120_v16  ;;  %v2091_v9 = vmul.f32 %v3557_v37, %v3557_v37  ;;  %v1401_v3 = vmul.f32 %v3462_v17, %v226_v14  ;;  %v1402_v5 = vmul.f32 %v3482_v36, %v227_v50  ;;  %v228_v17 = vld [vmem:[%s3564_s19 + $0x10] sm:$0xff]  ;;  %v229_v36 = vld [vmem:[%s3564_s19 + $0x18] sm:$0xff] }
 0x29e   : > { %v3587_v22 = vpop.eup %2955  ;;  %v2093_v28 = vmul.f32 %v3578_v46, %v3578_v46  ;;  %v1999_v18 = vsub.f32 -1.0, %v3514_v30  ;;  %v3598_v8 = vadd.f32 %v1016_v24, %v3338_v48  ;;  %2963 = vpow2.f32 %v1363_v40 }
 0x29f   : > { %v2152_v13 = vadd.f32 %v2151_v11, %v2121_v1  ;;  %v2123_v27 = vadd.f32 %v2091_v9, %v2059_v47  ;;  %v1433_v44 = vadd.f32 %v1401_v3, %v3370_v6  ;;  %v1434_v14 = vadd.f32 %v1402_v5, %v3383_v15  ;;  %v2757_v1 = vpop.f32.mrf.mxu1  ;;  %v2706_v3 = vpop.f32.mrf.mxu0 }
 0x2a0   : > { %v3600_v29 = vpop.eup %2957  ;;  %v2094_v50 = vmul.f32 %v3587_v22, %v3587_v22  ;;  %v2034_v24 = vmul.f32 %v3585_v43, %v3585_v43  ;;  %2965 = vpow2.f32 %v1367_v53  ;;  %v3615_v6 = vadd.f32 %v3538_v62, %v3318_v39 }
 0x2a1   : > { %v2153_v16 = vadd.f32 %v2152_v13, %v2122_v56  ;;  %v2092_v30 = vmul.f32 %v3600_v29, %v3600_v29  ;;  %v1323_v13 = vmul.f32 0.5, %v3590_v25  ;;  %v1465_v47 = vpack.c.bf16 %v1434_v14, %v1433_v44 }
 0x2a2   : > { %v2002_v9 = vsub.f32 -1.0, %v3536_v60  ;;  %v1403_v56 = vmul.f32 %v3456_v7, %v228_v17  ;;  %v1404_v40 = vmul.f32 %v3474_v31, %v229_v36  ;;  %v2125_v5 = vadd.f32 %v2093_v28, %v3520_v38  ;;  %v1258_v31 = vpop.f32.mrf.mxu1 }
 0x2a3   : > { %v2154_v11 = vadd.f32 %v2153_v16, %v2123_v27  ;;  %v2124_v15 = vadd.f32 %v2092_v30, %v2060_v61  ;;  %v2032_v53 = vmul.f32 %v3598_v8, %v3598_v8  ;;  %v2000_v27 = vsub.f32 -1.0, %v3553_v33  ;;  %2783 = vmatprep.mubr.bf16.mxu0 %v1465_v47 }
 0x2a4   : > { %v1321_v16 = vmul.f32 0.5, %v3615_v6  ;;  %v1435_v61 = vadd.f32 %v1403_v56, %v3356_v59  ;;  %v1436_v60 = vadd.f32 %v1404_v40, %v3379_v12  ;;  %v3629_v7 = vadd.f32 %v3555_v52, %v3318_v39  ;;  %v1032_v52 = vpop.f32.mrf.mxu0  ;;  %v2758_v47 = vpop.f32.mrf.mxu1 }
 0x2a5   : > { %v2155_v62 = vadd.f32 %v2154_v11, %v2124_v15  ;;  %v2126_v38 = vadd.f32 %v2094_v50, %v2062_v49  ;;  %v3634_v28 = vadd.f32 %v2705_v55, %v3338_v48  ;;  %v1373_v33 = vmul.f32 1.442695, %v1323_v13  ;;  %v230_v13 = vld [vmem:[%s3564_s19 + $0x20] sm:$0xff] }
 0x2a6   : > { %v3631_v44 = vpop.eup %2959  ;;  %v1369_v14 = vmul.f32 1.442695, %v1321_v16  ;;  %v1466_v36 = vpack.c.bf16 %v1436_v60, %v1435_v61  ;;  %v1324_v12 = vmul.f32 0.5, %v3629_v7  ;;  %v3640_v30 = vadd.f32 %v1245_v57, %v3318_v39 }
 0x2a7   : > { %v2156_v17 = vadd.f32 %v2155_v62, %v2125_v5  ;;  %v2095_v59 = vmul.f32 %v3631_v44, %v3631_v44  ;;  %v3642_v49 = vpop.eup %2961  ;;  %v2063_v55 = vadd.f32 %v3573_v20, %v1999_v18  ;;  %v4091_v15 = vsub.f32 -1.0, %v3501_v51  ;;  %v231_v5 = vld [vmem:[%s3564_s19 + $0x28] sm:$0xff]  ;;  %v2709_v51 = vpop.f32.mrf.mxu0 }
 0x2a8   : > { %2967 = vpow2.f32 %v1369_v14  ;;  %2784 = vmatmul.mubr.bf16.vlgmr.msra.gmra.mxu0 %v1466_v36  ;;  %v1375_v11 = vmul.f32 1.442695, %v1324_v12  ;;  %v3650_v40 = vadd.f32 %v1029_v35, %v3338_v48  ;;  %v1322_v57 = vmul.f32 0.5, %v3640_v30 }
 0x2a9   : > { %v2157_v50 = vadd.f32 %v2156_v17, %v2126_v38  ;;  %v2065_v56 = vadd.f32 %v3568_v10, %v4091_v15  ;;  %2969 = vpow2.f32 %v1373_v33  ;;  %2816 = vmatpush3.bf16.msra.mxu0 %v3324_v41  ;;  %v2127_v20 = vadd.f32 %v2095_v59, %v2063_v55  ;;  %v1261_v33 = vpop.f32.mrf.mxu1  ;;  %v1045_v36 = vpop.f32.mrf.mxu0 }
 0x2aa   : > { %v2066_v18 = vadd.f32 %v2034_v24, %v2002_v9  ;;  %v2064_v16 = vadd.f32 %v2032_v53, %v2000_v27  ;;  %v3657_v62 = vmul.f32 %v3634_v28, %v3634_v28  ;;  %2817 = vmatprep.subr.bf16.mxu0 %v3334_v45  ;;  %v2005_v35 = vsub.f32 -1.0, %v3590_v25  ;;  %v232_v53 = vld [vmem:[%s3564_s19 + $0x30] sm:$0xff]  ;;  %v233_v27 = vld [vmem:[%s3564_s19 + $0x38] sm:$0xff] }
 0x2ab   : > { %v3660_v10 = vpop.eup %2963  ;;  %v1371_v61 = vmul.f32 1.442695, %v1322_v57  ;;  %v3664_v60 = vadd.f32 %v2757_v1, %v3318_v39  ;;  %v1405_v41 = vmul.f32 %v3511_v19, %v230_v13  ;;  %v2158_v38 = vadd.f32 %v2157_v50, %v2127_v20  ;;  %v2761_v15 = vpop.f32.mrf.mxu1 }
 0x2ac   : > { %v2096_v24 = vmul.f32 %v3660_v10, %v3660_v10  ;;  %2971 = vpow2.f32 %v1375_v11  ;;  %v1406_v9 = vmul.f32 %v3540_v2, %v231_v5  ;;  %v2097_v25 = vmul.f32 %v3642_v49, %v3642_v49  ;;  %v2710_v20 = vpop.f32.mrf.mxu0 }
 0x2ad   : > { %v3672_v14 = vpop.eup %2965  ;;  %v2035_v1 = vmul.f32 %v3650_v40, %v3650_v40  ;;  %v3679_v19 = vadd.f32 %v2706_v3, %v3338_v48  ;;  %2973 = vpow2.f32 %v1371_v61  ;;  %2818 = vmatpush3.bf16.msra.mxu0 %v3334_v45  ;;  %v1437_v2 = vadd.f32 %v1405_v41, %v3405_v26 }
 0x2ae   : > { %v2128_v17 = vadd.f32 %v2096_v24, %v2064_v16  ;;  %v1438_v59 = vadd.f32 %v1406_v9, %v3448_v0  ;;  %v3685_v12 = vadd.f32 %v1258_v31, %v3318_v39  ;;  %2819 = vmatprep.subr.bf16.mxu0 %v3348_v54  ;;  %v2003_v55 = vsub.f32 -1.0, %v3615_v6  ;;  %v1274_v24 = vpop.f32.mrf.mxu1 }
 0x2af   : > { %v1327_v50 = vmul.f32 0.5, %v3664_v60  ;;  %v1407_v3 = vmul.f32 %v3516_v34, %v232_v53  ;;  %v1408_v11 = vmul.f32 %v3525_v63, %v233_v27  ;;  %v3693_v13 = vadd.f32 %v1032_v52, %v3338_v48 }
 0x2b0   : > { %v2159_v45 = vadd.f32 %v2158_v38, %v2128_v17  ;;  %v1467_v26 = vpack.c.bf16 %v1438_v59, %v1437_v2  ;;  %v1325_v0 = vmul.f32 0.5, %v3685_v12  ;;  %v2129_v31 = vadd.f32 %v2097_v25, %v2065_v56  ;;  %v234_v38 = vld [vmem:[%s3564_s19 + $0x40] sm:$0xff]  ;;  %v1048_v2 = vpop.f32.mrf.mxu0 }
 0x2b1   : > { %v2098_v57 = vmul.f32 %v3672_v14, %v3672_v14  ;;  %v1439_v6 = vadd.f32 %v1407_v3, %v3391_v21  ;;  %v1440_v5 = vadd.f32 %v1408_v11, %v3412_v32  ;;  %2820 = vmatpush3.bf16.msra.mxu0 %v3348_v54  ;;  %v2038_v34 = vmul.f32 %v3679_v19, %v3679_v19 }
 0x2b2   : > { %v2006_v63 = vsub.f32 -1.0, %v3629_v7  ;;  %v3705_v52 = vadd.f32 %v2709_v51, %v3338_v48  ;;  %2787 = vmatprep.mubr.bf16.mxu0 %v1467_v26  ;;  %v1377_v56 = vmul.f32 1.442695, %v1325_v0  ;;  %2821 = vmatprep.subr.bf16.mxu0 %v3367_v4  ;;  %v2160_v16 = vadd.f32 %v2159_v45, %v2129_v31  ;;  %v236_v0 = vld [vmem:[%s3564_s19 + $0x50] sm:$0xff]  ;;  %v237_v31 = vld [vmem:[%s3564_s19 + $0x58] sm:$0xff] }
 0x2b3   : > { %v1381_v21 = vmul.f32 1.442695, %v1327_v50  ;;  %v1468_v61 = vpack.c.bf16 %v1440_v5, %v1439_v6  ;;  %v3709_v32 = vadd.f32 %v2758_v47, %v3318_v39  ;;  %v2036_v41 = vmul.f32 %v3693_v13, %v3693_v13  ;;  %v235_v50 = vld [vmem:[%s3564_s19 + $0x48] sm:$0xff]  ;;  %v2713_v5 = vpop.f32.mrf.mxu0 }
 0x2b4   : > { %v2004_v7 = vsub.f32 -1.0, %v3640_v30  ;;  %2975 = vpow2.f32 %v1377_v56  ;;  %v3717_v51 = vadd.f32 %v1261_v33, %v3318_v39  ;;  %v2130_v9 = vadd.f32 %v2098_v57, %v2066_v18 }
 0x2b5   : > { %v3711_v54 = vpop.eup %2967  ;;  %v3723_v47 = vadd.f32 %v1045_v36, %v3338_v48  ;;  %2788 = vmatmul.mubr.bf16.gmra.mxu0 %v1468_v61  ;;  %v1328_v27 = vmul.f32 0.5, %v3709_v32  ;;  %v2069_v30 = vadd.f32 %v3657_v62, %v2005_v35  ;;  %v2067_v17 = vadd.f32 %v2035_v1, %v2003_v55  ;;  %v2762_v55 = vpop.f32.mrf.mxu1 }
 0x2b6   : > { %v2099_v53 = vmul.f32 %v3711_v54, %v3711_v54  ;;  %v3726_v25 = vpop.eup %2969  ;;  %v2070_v33 = vadd.f32 %v2038_v34, %v2006_v63  ;;  %v1326_v59 = vmul.f32 0.5, %v3717_v51  ;;  %2822 = vmatpush3.bf16.msra.mxu0 %v3367_v4  ;;  %v2161_v18 = vadd.f32 %v2160_v16, %v2130_v9 }
 0x2b7   : > { %2977 = vpow2.f32 %v1381_v21  ;;  %v1383_v36 = vmul.f32 1.442695, %v1328_v27  ;;  %v1409_v3 = vmul.f32 %v3557_v37, %v234_v38  ;;  %2823 = vmatprep.subr.bf16.mxu0 %v3399_v23  ;;  %v2068_v11 = vadd.f32 %v2036_v41, %v2004_v7  ;;  %v4093_v41 = vld [vmem:[#allocation8_spill] sm:$0xff]  ;;  %v1277_v38 = vpop.f32.mrf.mxu1 }
 0x2b8   : > { %v3736_v62 = vmul.f32 %v3705_v52, %v3705_v52  ;;  %v2009_v35 = vsub.f32 -1.0, %v3664_v60  ;;  %v1379_v1 = vmul.f32 1.442695, %v1326_v59  ;;  %v2101_v45 = vmul.f32 %v3726_v25, %v3726_v25 }
 0x2b9   : > { %v3739_v4 = vpop.eup %2971  ;;  %v2131_v26 = vadd.f32 %v2099_v53, %v2067_v17  ;;  %v2039_v37 = vmul.f32 %v3723_v47, %v3723_v47  ;;  %2979 = vpow2.f32 %v1383_v36  ;;  %v3750_v6 = vadd.f32 %v2710_v20, %v3338_v48  ;;  %v4092_v20 = vld [vmem:[#allocation4_spill] sm:$0xff] }
 0x2ba   : > { %v3747_v57 = vpop.eup %2973  ;;  %2981 = vpow2.f32 %v1379_v1  ;;  %v3753_v34 = vadd.f32 %v2761_v15, %v3318_v39  ;;  %v1410_v63 = vmul.f32 %v3600_v29, %v235_v50  ;;  %2824 = vmatpush3.bf16.msra.mxu0 %v3399_v23  ;;  %v3760_v21 = vadd.f32 %v1048_v2, %v3338_v48  ;;  %v4095_v50 = vld [vmem:[#allocation7_spill] sm:$0xff] }
 0x2bb   : > { %v2162_v56 = vadd.f32 %v2161_v18, %v2131_v26  ;;  %v2100_v16 = vmul.f32 %v3747_v57, %v3747_v57  ;;  %v1441_v61 = vadd.f32 %v1409_v3, %v3490_v42  ;;  %2825 = vmatprep.subr.bf16.mxu0 %v4092_v20  ;;  %v3766_v15 = vadd.f32 %v1274_v24, %v3318_v39  ;;  %v1061_v24 = vpop.f32.mrf.mxu0 }
 0x2bc   : > { %v1442_v7 = vadd.f32 %v1410_v63, %v4093_v41  ;;  %v1411_v29 = vmul.f32 %v3578_v46, %v236_v0  ;;  %v1412_v23 = vmul.f32 %v3587_v22, %v237_v31  ;;  %v2133_v9 = vadd.f32 %v2101_v45, %v2069_v30  ;;  %v4094_v30 = vld [vmem:[#allocation6_spill] sm:$0xff]  ;;  %v2765_v0 = vpop.f32.mrf.mxu1 }
 0x2bd   : > { %v2102_v53 = vmul.f32 %v3739_v4, %v3739_v4  ;;  %v2132_v27 = vadd.f32 %v2100_v16, %v2068_v11  ;;  %v2007_v17 = vsub.f32 -1.0, %v3685_v12  ;;  %v2042_v42 = vmul.f32 %v3750_v6, %v3750_v6  ;;  %v4096_v11 = vld [vmem:[#allocation5_spill] sm:$0xff] }
 0x2be   : > { %v1331_v2 = vmul.f32 0.5, %v3753_v34  ;;  %v1469_v59 = vpack.c.bf16 %v1442_v7, %v1441_v61  ;;  %v1329_v18 = vmul.f32 0.5, %v3766_v15  ;;  %2826 = vmatpush3.bf16.msra.mxu0 %v4092_v20  ;;  %v2010_v22 = vsub.f32 -1.0, %v3709_v32 }
 0x2bf   : > { %v2163_v46 = vadd.f32 %v2162_v56, %v2132_v27  ;;  %v1443_v36 = vadd.f32 %v1411_v29, %v4094_v30  ;;  %v1444_v3 = vadd.f32 %v1412_v23, %v4095_v50  ;;  %2827 = vmatprep.subr.bf16.mxu0 %v4096_v11  ;;  %v2040_v12 = vmul.f32 %v3760_v21, %v3760_v21  ;;  %v239_v29 = vld [vmem:[%s3564_s19 + $0x68] sm:$0xff] }
 0x2c0   : > { %v2008_v1 = vsub.f32 -1.0, %v3717_v51  ;;  %2791 = vmatprep.mubr.bf16.mxu0 %v1469_v59  ;;  %v1385_v45 = vmul.f32 1.442695, %v1329_v18  ;;  %v3786_v26 = vadd.f32 %v2762_v55, %v3318_v39  ;;  %v2134_v31 = vadd.f32 %v2102_v53, %v2070_v33  ;;  %v2714_v51 = vpop.f32.mrf.mxu0  ;;  %v238_v55 = vld [vmem:[%s3564_s19 + $0x60] sm:$0xff] }
 0x2c1   : > { %v3788_v32 = vpop.eup %2975  ;;  %v2164_v63 = vadd.f32 %v2163_v46, %v2133_v9  ;;  %v1470_v56 = vpack.c.bf16 %v1444_v3, %v1443_v36  ;;  %v3791_v16 = vadd.f32 %v1277_v38, %v3318_v39  ;;  %v1389_v20 = vmul.f32 1.442695, %v1331_v2  ;;  %v1290_v2 = vpop.f32.mrf.mxu1 }
 0x2c2   : > { %v2103_v61 = vmul.f32 %v3788_v32, %v3788_v32  ;;  %2983 = vpow2.f32 %v1385_v45  ;;  %v1332_v41 = vmul.f32 0.5, %v3786_v26  ;;  %2828 = vmatpush3.bf16.msra.mxu0 %v4096_v11  ;;  %v3799_v7 = vadd.f32 %v2713_v5, %v3338_v48  ;;  %v1064_v60 = vpop.f32.mrf.mxu0 }
 0x2c3   : > { %2792 = vmatmul.mubr.bf16.gmra.mxu0 %v1470_v56  ;;  %v1330_v33 = vmul.f32 0.5, %v3791_v16  ;;  %v2073_v38 = vadd.f32 %v3736_v62, %v2009_v35  ;;  %v2071_v9 = vadd.f32 %v2039_v37, %v2007_v17  ;;  %v2165_v53 = vadd.f32 %v2164_v63, %v2134_v31 }
 0x2c4   : > { %v3803_v23 = vpop.eup %2977  ;;  %v2074_v27 = vadd.f32 %v2042_v42, %v2010_v22  ;;  %v1391_v59 = vmul.f32 1.442695, %v1332_v41  ;;  %v3809_v5 = vadd.f32 %v2765_v0, %v3318_v39  ;;  %v1413_v46 = vmul.f32 %v3631_v44, %v238_v55  ;;  %v240_v44 = vld [vmem:[%s3564_s19 + $0x70] sm:$0xff]  ;;  %v241_v0 = vld [vmem:[%s3564_s19 + $0x78] sm:$0xff]  ;;  %v3846_v41 = vpop.f32.mrf.mxu0 }
 0x2c5   : > { %v1387_v18 = vmul.f32 1.442695, %v1330_v33  ;;  %v2135_v36 = vadd.f32 %v2103_v61, %v2071_v9  ;;  %v2072_v50 = vadd.f32 %v2040_v12, %v2008_v1  ;;  %2985 = vpow2.f32 %v1389_v20  ;;  %v2766_v12 = vpop.f32.mrf.mxu1 }
 0x2c6   : > { %v3812_v30 = vpop.eup %2979  ;;  %v1414_v62 = vmul.f32 %v3660_v10, %v239_v29  ;;  %v2105_v37 = vmul.f32 %v3803_v23, %v3803_v23  ;;  %v2045_v17 = vmul.f32 %v3799_v7, %v3799_v7  ;;  %v3822_v42 = vadd.f32 %v1061_v24, %v3338_v48 }
 0x2c7   : > { %v3815_v35 = vpop.eup %2981  ;;  %2987 = vpow2.f32 %v1387_v18  ;;  %v2166_v22 = vadd.f32 %v2165_v53, %v2135_v36  ;;  %v1445_v10 = vadd.f32 %v1413_v46, %v3543_v58  ;;  %v3830_v1 = vadd.f32 %v1064_v60, %v3338_v48  ;;  %v1293_v53 = vpop.f32.mrf.mxu1  ;;  %v4097_v46 = vld [vmem:[#allocation9_spill] sm:$0xff] }
 0x2c8   : > { %v2104_v3 = vmul.f32 %v3815_v35, %v3815_v35  ;;  %v1446_v11 = vadd.f32 %v1414_v62, %v3598_v8  ;;  %2989 = vpow2.f32 %v1391_v59  ;;  %v1335_v45 = vmul.f32 0.5, %v3809_v5  ;;  %v1077_v62 = vpop.f32.mrf.mxu0 }
 0x2c9   : > { %v3834_v24 = vadd.f32 %v1290_v2, %v3318_v39  ;;  %v2106_v31 = vmul.f32 %v3812_v30, %v3812_v30  ;;  %v1415_v58 = vmul.f32 %v3642_v49, %v240_v44  ;;  %v2013_v8 = vsub.f32 -1.0, %v3753_v34 }
 0x2ca   : > { %v2136_v63 = vadd.f32 %v2104_v3, %v2072_v50  ;;  %v1471_v56 = vpack.c.bf16 %v1446_v11, %v1445_v10  ;;  %v2043_v61 = vmul.f32 %v3822_v42, %v3822_v42  ;;  %v3844_v20 = vadd.f32 %v2714_v51, %v3338_v48  ;;  %v242_v50 = vld [vmem:[%s3564_s19 + $0x80] sm:$0xff]  ;;  %v244_v3 = vld [vmem:[%s3564_s19 + $0x90] sm:$0xff] }
 0x2cb   : > { %v1333_v55 = vmul.f32 0.5, %v3834_v24  ;;  %v2137_v33 = vadd.f32 %v2105_v37, %v2073_v38  ;;  %v2011_v9 = vsub.f32 -1.0, %v3766_v15  ;;  %v1416_v49 = vmul.f32 %v3672_v14, %v241_v0 }
 0x2cc   : > { %v2167_v29 = vadd.f32 %v2166_v22, %v2136_v63  ;;  %2795 = vmatprep.mubr.bf16.mxu0 %v1471_v56  ;;  %v2044_v34 = vmul.f32 %v3830_v1, %v3830_v1  ;;  %v1397_v51 = vmul.f32 1.442695, %v1335_v45  ;;  %v3854_v59 = vadd.f32 %v2766_v12, %v3318_v39  ;;  %v243_v22 = vld [vmem:[%s3564_s19 + $0x88] sm:$0xff] }
 0x2cd   : > { %v1393_v2 = vmul.f32 1.442695, %v1333_v55  ;;  %v2138_v18 = vadd.f32 %v2106_v31, %v2074_v27  ;;  %v1447_v36 = vadd.f32 %v1415_v58, %v4097_v46  ;;  %v1448_v15 = vadd.f32 %v1416_v49, %v3585_v43  ;;  %v245_v27 = vld [vmem:[%s3564_s19 + $0x98] sm:$0xff]  ;;  %v246_v58 = vld [vmem:[%s3564_s19 + $0xa0] sm:$0xff]  ;;  %v247_v49 = vld [vmem:[%s3564_s19 + $0xa8] sm:$0xff] }
 0x2ce   : > { %v2168_v38 = vadd.f32 %v2167_v29, %v2137_v33  ;;  %v2012_v60 = vsub.f32 -1.0, %v3791_v16  ;;  %v1336_v37 = vmul.f32 0.5, %v3854_v59  ;;  %v3862_v44 = vadd.f32 %v1293_v53, %v3318_v39  ;;  %v2718_v29 = vpop.f32.mrf.mxu0 }
 0x2cf   : > { %v2984_v14 = vpop.eup %2983  ;;  %2991 = vpow2.f32 %v1393_v2  ;;  %v2075_v10 = vadd.f32 %v2043_v61, %v2011_v9  ;;  %v1472_v45 = vpack.c.bf16 %v1448_v15, %v1447_v36  ;;  %v1417_v0 = vmul.f32 %v3711_v54, %v242_v50  ;;  %v251_v2 = vld [vmem:[%s3564_s19 + $0xc8] sm:$0xff] }
 0x2d0   : > { %v2107_v11 = vmul.f32 %v2984_v14, %v2984_v14  ;;  %v2169_v12 = vadd.f32 %v2168_v38, %v2138_v18  ;;  %2993 = vpow2.f32 %v1397_v51  ;;  %v1399_v43 = vmul.f32 1.442695, %v1336_v37  ;;  %v1080_v50 = vpop.f32.mrf.mxu0 }
 0x2d1   : > { %v1334_v16 = vmul.f32 0.5, %v3862_v44  ;;  %2796 = vmatmul.mubr.bf16.gmra.mxu0 %v1472_v45  ;;  %v1418_v39 = vmul.f32 %v3747_v57, %v243_v22  ;;  %v1419_v63 = vmul.f32 %v3726_v25, %v244_v3  ;;  %v1420_v56 = vmul.f32 %v3739_v4, %v245_v27 }
 0x2d2   : > { %v2139_v31 = vadd.f32 %v2107_v11, %v2075_v10  ;;  %v3873_v61 = vpop.eup %2985  ;;  %v2077_v55 = vadd.f32 %v2045_v17, %v2013_v8  ;;  %v2076_v33 = vadd.f32 %v2044_v34, %v2012_v60  ;;  %2995 = vpow2.f32 %v1399_v43  ;;  %v249_v34 = vld [vmem:[%s3564_s19 + $0xb8] sm:$0xff]  ;;  %v248_v60 = vld [vmem:[%s3564_s19 + $0xb0] sm:$0xff] }
 0x2d3   : > { %v1395_v9 = vmul.f32 1.442695, %v1334_v16  ;;  %v1449_v57 = vadd.f32 %v1417_v0, %v3650_v40  ;;  %v1450_v25 = vadd.f32 %v1418_v39, %v3693_v13  ;;  %v1451_v4 = vadd.f32 %v1419_v63, %v3634_v28  ;;  %v250_v28 = vld [vmem:[%s3564_s19 + $0xc0] sm:$0xff] }
 0x2d4   : > { %v2988_v54 = vpop.eup %2987  ;;  %v2170_v53 = vadd.f32 %v2169_v12, %v2139_v31  ;;  %v1452_v17 = vadd.f32 %v1420_v56, %v3679_v19  ;;  %v1421_v8 = vmul.f32 %v3788_v32, %v246_v58  ;;  %v2109_v38 = vmul.f32 %v3873_v61, %v3873_v61  ;;  %v253_v56 = vld [vmem:[%s3564_s19 + $0xd8] sm:$0xff] }
 0x2d5   : > { %v2108_v51 = vmul.f32 %v2988_v54, %v2988_v54  ;;  %2997 = vpow2.f32 %v1395_v9  ;;  %v2990_v18 = vpop.eup %2989  ;;  %v2046_v40 = vmul.f32 %v3844_v20, %v3844_v20  ;;  %v1473_v46 = vpack.c.bf16 %v1450_v25, %v1449_v57 }
 0x2d6   : > { %v1422_v13 = vmul.f32 %v3815_v35, %v247_v49  ;;  %v2014_v36 = vsub.f32 -1.0, %v3786_v26  ;;  %v1078_v19 = vadd.f32 %v1077_v62, %v3338_v48  ;;  %v1474_v32 = vpack.c.bf16 %v1452_v17, %v1451_v4 }
 0x2d7   : > { %v2140_v15 = vadd.f32 %v2108_v51, %v2076_v33  ;;  %2799 = vmatprep.mubr.bf16.mxu0 %v1473_v46  ;;  %v1453_v37 = vadd.f32 %v1421_v8, %v3723_v47  ;;  %v1424_v3 = vmul.f32 %v3812_v30, %v249_v34  ;;  %v1426_v27 = vmul.f32 %v2988_v54, %v251_v2  ;;  %v252_v54 = vld [vmem:[%s3564_s19 + $0xd0] sm:$0xff]  ;;  %v255_v51 = vld [vmem:[%s3564_s19 + $0xe8] sm:$0xff] }
 0x2d8   : > { %v1454_v22 = vadd.f32 %v1422_v13, %v3760_v21  ;;  %v2110_v10 = vmul.f32 %v2990_v18, %v2990_v18  ;;  %v1425_v35 = vmul.f32 %v2984_v14, %v250_v28  ;;  %v2141_v12 = vadd.f32 %v2109_v38, %v2077_v55 }
 0x2d9   : > { %v2171_v11 = vadd.f32 %v2170_v53, %v2140_v15  ;;  %v1081_v26 = vadd.f32 %v1080_v50, %v3338_v48  ;;  %2800 = vmatmul.mubr.bf16.gmra.mxu0 %v1474_v32  ;;  %v1423_v45 = vmul.f32 %v3803_v23, %v248_v60  ;;  %v2078_v43 = vadd.f32 %v2046_v40, %v2014_v36  ;;  %v257_v36 = vld [vmem:[%s3564_s19 + $0xf8] sm:$0xff]  ;;  %v256_v60 = vld [vmem:[%s3564_s19 + $0xf0] sm:$0xff] }
 0x2da   : > { %v1475_v62 = vpack.c.bf16 %v1454_v22, %v1453_v37  ;;  %v2047_v16 = vmul.f32 %v1078_v19, %v1078_v19  ;;  %v2015_v47 = vsub.f32 -1.0, %v3834_v24  ;;  %v1458_v21 = vadd.f32 %v1426_v27, %v3830_v1 }
 0x2db   : > { %v1086_v0 = vadd.f32 %v3846_v41, %v3338_v48  ;;  %v1456_v14 = vadd.f32 %v1424_v3, %v3750_v6  ;;  %v2172_v31 = vadd.f32 %v2171_v11, %v2141_v12  ;;  %v2142_v39 = vadd.f32 %v2110_v10, %v2078_v43  ;;  %v254_v41 = vld [vmem:[%s3564_s19 + $0xe0] sm:$0xff] }
 0x2dc   : > { %v2992_v30 = vpop.eup %2991  ;;  %2803 = vmatprep.mubr.bf16.mxu0 %v1475_v62  ;;  %v1457_v23 = vadd.f32 %v1425_v35, %v3822_v42  ;;  %v1089_v24 = vadd.f32 %v2718_v29, %v3338_v48  ;;  %v2048_v55 = vmul.f32 %v1081_v26, %v1081_v26  ;;  %v2016_v1 = vsub.f32 -1.0, %v3862_v44  ;;  %v4098_v62 = vld [vmem:[#allocation2_spill] sm:$0xff] }
 0x2dd   : > { %v2111_v63 = vmul.f32 %v2992_v30, %v2992_v30  ;;  %v2994_v58 = vpop.eup %2993  ;;  %v1455_v33 = vadd.f32 %v1423_v45, %v3705_v52  ;;  %v2079_v9 = vadd.f32 %v2047_v16, %v2015_v47  ;;  %v2173_v6 = vadd.f32 %v2172_v31, %v2142_v39  ;;  %v4099_v16 = vld [vmem:[#allocation3_spill] sm:$0xff] }
 0x2de   : > { %v1477_v49 = vpack.c.bf16 %v1458_v21, %v1457_v23  ;;  %v2049_v57 = vmul.f32 %v1086_v0, %v1086_v0  ;;  %v2017_v25 = vsub.f32 -1.0, %v3809_v5  ;;  %v1428_v4 = vmul.f32 %v2990_v18, %v253_v56 }
 0x2df   : > { %v2996_v53 = vpop.eup %2995  ;;  %v1476_v42 = vpack.c.bf16 %v1456_v14, %v1455_v33  ;;  %v2143_v17 = vadd.f32 %v2111_v63, %v2079_v9  ;;  %v1429_v8 = vmul.f32 %v2992_v30, %v254_v41  ;;  %v2050_v29 = vmul.f32 %v1089_v24, %v1089_v24 }
 0x2e0   : > { %v2018_v44 = vsub.f32 -1.0, %v3854_v59  ;;  %v2080_v52 = vadd.f32 %v2048_v55, %v2016_v1  ;;  %v1427_v34 = vmul.f32 %v3873_v61, %v252_v54  ;;  %v2113_v40 = vmul.f32 %v2994_v58, %v2994_v58 }
 0x2e1   : > { %2804 = vmatmul.mubr.bf16.gmra.mxu0 %v1476_v42  ;;  %v2174_v5 = vadd.f32 %v2173_v6, %v2143_v17  ;;  %v2081_v46 = vadd.f32 %v2049_v57, %v2017_v25  ;;  %v1460_v18 = vadd.f32 %v1428_v4, %v3844_v20  ;;  %v1461_v13 = vadd.f32 %v1429_v8, %v1078_v19 }
 0x2e2   : > { %v2998_v48 = vpop.eup %2997  ;;  %2807 = vmatprep.mubr.bf16.mxu0 %v1477_v49  ;;  %v2114_v15 = vmul.f32 %v2996_v53, %v2996_v53  ;;  %v1459_v59 = vadd.f32 %v1427_v34, %v3799_v7  ;;  %v2082_v37 = vadd.f32 %v2050_v29, %v2018_v44  ;;  %v1432_v27 = vmul.f32 %v2996_v53, %v257_v36  ;;  %v2934_v7 = vld [vmem:[%s4068_s2 + $0x140] sm:$0xff]  }
 0x2e3   : > { %v1430_v2 = vmul.f32 %v2998_v48, %v255_v51  ;;  %v2112_v38 = vmul.f32 %v2998_v48, %v2998_v48  ;;  %v2145_v22 = vadd.f32 %v2113_v40, %v2081_v46  ;;  %v1431_v35 = vmul.f32 %v2994_v58, %v256_v60  ;;  %2829 = vmatprep.subr.bf16.mxu0 %v2934_v7 }
 0x2e4   : > { %v1478_v3 = vpack.c.bf16 %v1460_v18, %v1459_v59  ;;  %v2146_v10 = vadd.f32 %v2114_v15, %v2082_v37  ;;  %v1464_v19 = vadd.f32 %v1432_v27, %v1089_v24  ;;  %2870 = vmatprep.subr.bf16.mxu1 %v2934_v7  ;;  %2830 = vmatpush3.bf16.msra.mxu0 %v2934_v7  ;;  %v1483_v45 = vsub.s32 4, %v4098_v62 }
 0x2e5   : > { %v1462_v28 = vadd.f32 %v1430_v2, %v1081_v26  ;;  %v2144_v50 = vadd.f32 %v2112_v38, %v2080_v52  ;;  %v1463_v12 = vadd.f32 %v1431_v35, %v1086_v0  ;;  %2878 = vmatpush3.bf16.msra.mxu1 %v2934_v7  ;;  %vm2296_vm1 = vcmp.eq.s32.totalorder %v4098_v62, 0 }
 0x2e6   : > { %v3922_v47 = vrot.slane %v4099_v16, %v1483_v45 }
 0x2e7   : > { %v1479_v32 = vpack.c.bf16 %v1462_v28, %v1461_v13  ;;  %v2175_v61 = vadd.f32 %v2174_v5, %v2144_v50  ;;  %v1480_v26 = vpack.c.bf16 %v1464_v19, %v1463_v12 }
 0x2e9   : > { %v2176_v11 = vadd.f32 %v2175_v61, %v2145_v22  ;;  %2808 = vmatmul.mubr.bf16.gmra.mxu0 %v1478_v3 }
 0x2ea   : > { %2811 = vmatprep.mubr.bf16.mxu0 %v1479_v32 }
 0x2eb   : > { %v2177_v20 = vadd.f32 %v2176_v11, %v2146_v10 }
 0x2ed   : > { %2178 = vadd.xlane.f32.xlu0 %v2177_v20 }
 0x2f1   : > { %2812 = vmatmul.mubr.bf16.gmra.mxu0 %v1480_v26 }
 0x368   : > { %v2785_v43 = vpop.f32.mrf.mxu0 }
 0x369   : > { %v1576_v31 = vadd.f32 %v2785_v43, %v3922_v47 }
 0x36a   : > { %v1567_v21 = vpop.f32.mrf.mxu0 }
 0x36b   : > { %v1568_v0 = vadd.f32 %v1567_v21, %v3922_v47  ;;  %v1696_v24 = vmax.f32 %v1576_v31, 0.0 }
 0x36c   : > { %v2786_v30 = vpop.f32.mrf.mxu0 }
 0x36d   : > { %v1579_v14 = vadd.f32 %v2786_v30, %v3922_v47  ;;  %v1694_v56 = vmax.f32 %v1568_v0, 0.0 }
 0x36e   : > { %v1570_v39 = vpop.f32.mrf.mxu0 }
 0x36f   : > { %v1571_v63 = vadd.f32 %v1570_v39, %v3922_v47  ;;  %v1697_v23 = vmax.f32 %v1579_v14, 0.0 }
 0x371   : > { %v1695_v58 = vmax.f32 %v1571_v63, 0.0  ;;  %v1727_v1 = vpack.c.bf16 %v1697_v23, %v1696_v24 }
 0x373   : > { %v1726_v55 = vpack.c.bf16 %v1695_v58, %v1694_v56 }
 0x375   : > { %v2789_v33 = vpop.f32.mrf.mxu0  ;;  %2831 = vmatprep.mubr.bf16.mxu0 %v1726_v55 }
 0x376   : > { %v2179_v41 = vpop.xlane.xlu0 %2178  ;;  %2832 = vmatmul.mubr.bf16.vlgmr.msra.gmra.mxu0 %v1727_v1  ;;  %v1592_v42 = vadd.f32 %v2789_v33, %v3922_v47 }
 0x377   : > { %v2180_v9 = vrot.slane %v2179_v41, 4  ;;  %v1583_v49 = vpop.f32.mrf.mxu0 }
 0x378   : > { %v1584_v53 = vadd.f32 %v1583_v49, %v3922_v47  ;;  %v1700_v44 = vmax.f32 %v1592_v42, 0.0 }
 0x379   : > { %v2181_v54 = vadd.f32 %v2180_v9, %v2179_v41  ;;  %v2790_v6 = vpop.f32.mrf.mxu0 }
 0x37a   : > { %v1595_v57 = vadd.f32 %v2790_v6, %v3922_v47  ;;  %v1698_v48 = vmax.f32 %v1584_v53, 0.0 }
 0x37b   : > { %v2182_v25 = vrot.slane %v2181_v54, 2  ;;  %v1586_v4 = vpop.f32.mrf.mxu0 }
 0x37c   : > { %v1587_v51 = vadd.f32 %v1586_v4, %v3922_v47  ;;  %v1701_v17 = vmax.f32 %v1595_v57, 0.0 }
 0x37d   : > { %v2183_v8 = vadd.f32 %v2182_v25, %v2181_v54 }
 0x37e   : > { %v1699_v29 = vmax.f32 %v1587_v51, 0.0  ;;  %v1729_v2 = vpack.c.bf16 %v1701_v17, %v1700_v44 }
 0x37f   : > { %v2184_v52 = vrot.slane %v2183_v8, 1 }
 0x380   : > { %v1728_v34 = vpack.c.bf16 %v1699_v29, %v1698_v48 }
 0x381   : > { %v2185_v38 = vadd.f32 %v2184_v52, %v2183_v8 }
 0x382   : > { %2835 = vmatprep.mubr.bf16.mxu1 %v1728_v34 }
 0x383   : > { %v2793_v40 = vpop.f32.mrf.mxu0  ;;  %2879 = vpush %v2185_v38  ;;  %2836 = vmatmul.mubr.bf16.vlgmr.msra.gmra.mxu1 %v1729_v2 }
 0x384   : > { %v1608_v28 = vadd.f32 %v2793_v40, %v3922_v47 }
 0x385   : > { %v1599_v5 = vpop.f32.mrf.mxu0 }
 0x386   : > { %v1600_v18 = vadd.f32 %v1599_v5, %v3922_v47  ;;  %v1704_v60 = vmax.f32 %v1608_v28, 0.0 }
 0x387   : > { %v2794_v46 = vpop.f32.mrf.mxu0 }
 0x388   : > { %v1611_v13 = vadd.f32 %v2794_v46, %v3922_v47  ;;  %v1702_v59 = vmax.f32 %v1600_v18, 0.0 }
 0x389   : > { %v1602_v36 = vpop.f32.mrf.mxu0 }
 0x38a   : > { %v1603_v15 = vadd.f32 %v1602_v36, %v3922_v47  ;;  %v1705_v50 = vmax.f32 %v1611_v13, 0.0 }
 0x38c   : > { %v1703_v32 = vmax.f32 %v1603_v15, 0.0  ;;  %v1731_v22 = vpack.c.bf16 %v1705_v50, %v1704_v60 }
 0x38e   : > { %v1730_v37 = vpack.c.bf16 %v1703_v32, %v1702_v59 }
 0x390   : > { %2839 = vmatprep.mubr.bf16.mxu1 %v1730_v37 }
 0x391   : > { %2840 = vmatmul.mubr.bf16.gmra.mxu1 %v1731_v22  ;;  %v2797_v61 = vpop.f32.mrf.mxu0 }
 0x392   : > { %v1624_v35 = vadd.f32 %v2797_v61, %v3922_v47 }
 0x393   : > { %v1615_v3 = vpop.f32.mrf.mxu0 }
 0x394   : > { %v1616_v10 = vadd.f32 %v1615_v3, %v3922_v47  ;;  %v1708_v43 = vmax.f32 %v1624_v35, 0.0 }
 0x395   : > { %v2798_v27 = vpop.f32.mrf.mxu0 }
 0x396   : > { %v1627_v11 = vadd.f32 %v2798_v27, %v3922_v47  ;;  %v1706_v7 = vmax.f32 %v1616_v10, 0.0 }
 0x397   : > { %v1618_v20 = vpop.f32.mrf.mxu0 }
 0x398   : > { %v1619_v19 = vadd.f32 %v1618_v20, %v3922_v47  ;;  %v1709_v12 = vmax.f32 %v1627_v11, 0.0 }
 0x399   : > { %v2801_v26 = vpop.f32.mrf.mxu0 }
 0x39a   : > { %v1707_v45 = vmax.f32 %v1619_v19, 0.0  ;;  %v1733_v0 = vpack.c.bf16 %v1709_v12, %v1708_v43  ;;  %v1640_v63 = vadd.f32 %v2801_v26, %v3922_v47  ;;  %v1744_v26 = vsub.s32 5, %v4098_v62 }
 0x39b   : > { %v1631_v21 = vpop.f32.mrf.mxu0 }
 0x39c   : > { %v1732_v30 = vpack.c.bf16 %v1707_v45, %v1706_v7  ;;  %v1632_v31 = vadd.f32 %v1631_v21, %v3922_v47  ;;  %v1712_v33 = vmax.f32 %v1640_v63, 0.0  ;;  %v3958_v7 = vrot.slane %v4099_v16, %v1744_v26  ;;  %v3000_v63 = vld [vmem:[%s3093_s28 + $0x10] sm:$0xff]  ;;  %v3001_v16 = vld [vmem:[%s3093_s28 + $0x8] sm:$0xff] }
 0x39d   : > { %v2802_v14 = vpop.f32.mrf.mxu0 }
 0x39e   : > { %v1643_v39 = vadd.f32 %v2802_v14, %v3922_v47  ;;  %2843 = vmatprep.mubr.bf16.mxu1 %v1732_v30  ;;  %v1710_v55 = vmax.f32 %v1632_v31, 0.0 }
 0x39f   : > { %v1634_v23 = vpop.f32.mrf.mxu0  ;;  %2844 = vmatmul.mubr.bf16.gmra.mxu1 %v1733_v0  ;;  %v2999_v0 = vld [vmem:[%s3093_s28] sm:$0xff] }
 0x3a0   : > { %v1635_v56 = vadd.f32 %v1634_v23, %v3922_v47  ;;  %v1713_v58 = vmax.f32 %v1643_v39, 0.0 }
 0x3a1   : > { %v2805_v24 = vpop.f32.mrf.mxu0 }
 0x3a2   : > { %v1711_v1 = vmax.f32 %v1635_v56, 0.0  ;;  %v1735_v49 = vpack.c.bf16 %v1713_v58, %v1712_v33  ;;  %v1656_v57 = vadd.f32 %v2805_v24, %v3922_v47 }
 0x3a3   : > { %v1647_v41 = vpop.f32.mrf.mxu0 }
 0x3a4   : > { %v1734_v9 = vpack.c.bf16 %v1711_v1, %v1710_v55  ;;  %v1648_v6 = vadd.f32 %v1647_v41, %v3922_v47  ;;  %v1716_v48 = vmax.f32 %v1656_v57, 0.0  ;;  %v3002_v55 = vld [vmem:[%s3093_s28 + $0x18] sm:$0xff] }
 0x3a5   : > { %v2806_v54 = vpop.f32.mrf.mxu0 }
 0x3a6   : > { %v1659_v53 = vadd.f32 %v2806_v54, %v3922_v47  ;;  %2847 = vmatprep.mubr.bf16.mxu1 %v1734_v9  ;;  %v1714_v17 = vmax.f32 %v1648_v6, 0.0 }
 0x3a7   : > { %v1650_v25 = vpop.f32.mrf.mxu0  ;;  %2848 = vmatmul.mubr.bf16.gmra.mxu1 %v1735_v49 }
 0x3a8   : > { %v1651_v42 = vadd.f32 %v1650_v25, %v3922_v47  ;;  %v1717_v4 = vmax.f32 %v1659_v53, 0.0 }
 0x3a9   : > { %v2809_v51 = vpop.f32.mrf.mxu0 }
 0x3aa   : > { %v1715_v8 = vmax.f32 %v1651_v42, 0.0  ;;  %v1737_v52 = vpack.c.bf16 %v1717_v4, %v1716_v48  ;;  %v1672_v40 = vadd.f32 %v2809_v51, %v3922_v47  ;;  %v3003_v48 = vld [vmem:[%s3093_s28 + $0x20] sm:$0xff] }
 0x3ab   : > { %v1663_v29 = vpop.f32.mrf.mxu0 }
 0x3ac   : > { %v1736_v44 = vpack.c.bf16 %v1715_v8, %v1714_v17  ;;  %v1664_v2 = vadd.f32 %v1663_v29, %v3922_v47  ;;  %v1720_v15 = vmax.f32 %v1672_v40, 0.0 }
 0x3ad   : > { %v2810_v34 = vpop.f32.mrf.mxu0 }
 0x3ae   : > { %v1675_v38 = vadd.f32 %v2810_v34, %v3922_v47  ;;  %2851 = vmatprep.mubr.bf16.mxu1 %v1736_v44  ;;  %v1718_v28 = vmax.f32 %v1664_v2, 0.0  ;;  %v3004_v34 = vld [vmem:[%s3093_s28 + $0x30] sm:$0xff] }
 0x3af   : > { %v1666_v5 = vpop.f32.mrf.mxu0  ;;  %2852 = vmatmul.mubr.bf16.gmra.mxu1 %v1737_v52 }
 0x3b0   : > { %v1667_v46 = vadd.f32 %v1666_v5, %v3922_v47  ;;  %v1721_v18 = vmax.f32 %v1675_v38, 0.0 }
 0x3b1   : > { %v2813_v13 = vpop.f32.mrf.mxu0 }
 0x3b2   : > { %v1719_v36 = vmax.f32 %v1667_v46, 0.0  ;;  %v1739_v32 = vpack.c.bf16 %v1721_v18, %v1720_v15  ;;  %v1688_v61 = vadd.f32 %v2813_v13, %v3922_v47  ;;  %v3005_v18 = vld [vmem:[%s3093_s28 + $0x28] sm:$0xff]  ;;  %v3006_v15 = vld [vmem:[%s3093_s28 + $0x38] sm:$0xff] }
 0x3b3   : > { %v1679_v50 = vpop.f32.mrf.mxu0 }
 0x3b4   : > { %v1738_v59 = vpack.c.bf16 %v1719_v36, %v1718_v28  ;;  %v1680_v37 = vadd.f32 %v1679_v50, %v3922_v47  ;;  %v1724_v20 = vmax.f32 %v1688_v61, 0.0 }
 0x3b5   : > { %v2814_v60 = vpop.f32.mrf.mxu0 }
 0x3b6   : > { %v1691_v22 = vadd.f32 %v2814_v60, %v3922_v47  ;;  %2855 = vmatprep.mubr.bf16.mxu1 %v1738_v59  ;;  %v1722_v11 = vmax.f32 %v1680_v37, 0.0 }
 0x3b7   : > { %v1682_v3 = vpop.f32.mrf.mxu0  ;;  %2856 = vmatmul.mubr.bf16.gmra.mxu1 %v1739_v32 }
 0x3b8   : > { %v1683_v27 = vadd.f32 %v1682_v3, %v3922_v47  ;;  %v1725_v10 = vmax.f32 %v1691_v22, 0.0 }
 0x3ba   : > { %v1723_v35 = vmax.f32 %v1683_v27, 0.0  ;;  %v1741_v12 = vpack.c.bf16 %v1725_v10, %v1724_v20 }
 0x3bc   : > { %v1740_v19 = vpack.c.bf16 %v1723_v35, %v1722_v11 }
 0x3be   : > { %2859 = vmatprep.mubr.bf16.mxu1 %v1740_v19  ;;  %v3007_v19 = vld [vmem:[%s3093_s28 + $0x40] sm:$0xff] }
 0x3bf   : > { %2860 = vmatmul.mubr.bf16.gmra.mxu1 %v1741_v12 }
 0x436   : > { %v2833_v45 = vpop.f32.mrf.mxu0 }
 0x437   : > { %v1837_v47 = vadd.f32 %v2833_v45, %v3958_v7 }
 0x438   : > { %v1828_v43 = vpop.f32.mrf.mxu0 }
 0x439   : > { %v1829_v21 = vadd.f32 %v1828_v43, %v3958_v7  ;;  %v1957_v23 = vsub.f32 %v3000_v63, %v1837_v47 }
 0x43a   : > { %v2834_v30 = vpop.f32.mrf.mxu0 }
 0x43b   : > { %v1955_v14 = vsub.f32 %v2999_v0, %v1829_v21  ;;  %v1840_v31 = vadd.f32 %v2834_v30, %v3958_v7  ;;  %v2190_v33 = vmul.f32 %v1957_v23, %v1957_v23  ;;  %v3008_v21 = vld [vmem:[%s3093_s28 + $0x50] sm:$0xff] }
 0x43c   : > { %v1831_v39 = vpop.f32.mrf.mxu0 }
 0x43d   : > { %v1832_v56 = vadd.f32 %v1831_v39, %v3958_v7  ;;  %v2188_v58 = vmul.f32 %v1955_v14, %v1955_v14  ;;  %v1958_v1 = vsub.f32 %v3002_v55, %v1840_v31  ;;  %v2223_v57 = vsel %vm392_vm0, %v2190_v33, 0.0  ;;  %v3009_v31 = vld [vmem:[%s3093_s28 + $0x48] sm:$0xff] }
 0x43f   : > { %v1956_v24 = vsub.f32 %v3001_v16, %v1832_v56  ;;  %v2220_v9 = vsel %vm392_vm0, %v2188_v58, 0.0  ;;  %v2191_v6 = vmul.f32 %v1958_v1, %v1958_v1  ;;  %v3010_v58 = vld [vmem:[%s3093_s28 + $0x58] sm:$0xff] }
 0x441   : > { %v2189_v41 = vmul.f32 %v1956_v24, %v1956_v24  ;;  %v2225_v8 = vsel %vm392_vm0, %v2191_v6, 0.0 }
 0x443   : > { %v2221_v49 = vsel %vm392_vm0, %v2189_v41, 0.0  ;;  %v2837_v54 = vpop.f32.mrf.mxu1 }
 0x444   : > { %v2222_v53 = vadd.f32 %v2221_v49, %v2220_v9  ;;  %v1853_v4 = vadd.f32 %v2837_v54, %v3958_v7 }
 0x445   : > { %v1844_v25 = vpop.f32.mrf.mxu1 }
 0x446   : > { %v2224_v42 = vadd.f32 %v2223_v57, %v2222_v53  ;;  %v1845_v51 = vadd.f32 %v1844_v25, %v3958_v7  ;;  %v1961_v2 = vsub.f32 %v3004_v34, %v1853_v4  ;;  %v3011_v25 = vld [vmem:[%s3093_s28 + $0x60] sm:$0xff] }
 0x447   : > { %v2838_v17 = vpop.f32.mrf.mxu1 }
 0x448   : > { %v1959_v29 = vsub.f32 %v3003_v48, %v1845_v51  ;;  %v2226_v44 = vadd.f32 %v2225_v8, %v2224_v42  ;;  %v1856_v40 = vadd.f32 %v2838_v17, %v3958_v7  ;;  %v2194_v36 = vmul.f32 %v1961_v2, %v1961_v2  ;;  %v3012_v8 = vld [vmem:[%s3093_s28 + $0x70] sm:$0xff]  ;;  %v3013_v2 = vld [vmem:[%s3093_s28 + $0x78] sm:$0xff] }
 0x449   : > { %v1847_v52 = vpop.f32.mrf.mxu1 }
 0x44a   : > { %v2192_v38 = vmul.f32 %v1959_v29, %v1959_v29  ;;  %v1848_v5 = vadd.f32 %v1847_v52, %v3958_v7  ;;  %v1962_v50 = vsub.f32 %v3006_v15, %v1856_v40  ;;  %v2231_v22 = vsel %vm392_vm0, %v2194_v36, 0.0  ;;  %v3014_v40 = vld [vmem:[%s3093_s28 + $0x68] sm:$0xff] }
 0x44c   : > { %v2227_v46 = vsel %vm392_vm0, %v2192_v38, 0.0  ;;  %v1960_v13 = vsub.f32 %v3005_v18, %v1848_v5  ;;  %v2195_v61 = vmul.f32 %v1962_v50, %v1962_v50 }
 0x44d   : > { %v2228_v28 = vadd.f32 %v2227_v46, %v2226_v44 }
 0x44e   : > { %v2193_v59 = vmul.f32 %v1960_v13, %v1960_v13  ;;  %v2233_v20 = vsel %vm392_vm0, %v2195_v61, 0.0 }
 0x450   : > { %v2229_v32 = vsel %vm392_vm0, %v2193_v59, 0.0 }
 0x451   : > { %v2230_v60 = vadd.f32 %v2229_v32, %v2228_v28  ;;  %v2841_v37 = vpop.f32.mrf.mxu1 }
 0x452   : > { %v1869_v11 = vadd.f32 %v2841_v37, %v3958_v7 }
 0x453   : > { %v2232_v3 = vadd.f32 %v2231_v22, %v2230_v60  ;;  %v1860_v27 = vpop.f32.mrf.mxu1  ;;  %v3015_v60 = vld [vmem:[%s3093_s28 + $0x80] sm:$0xff] }
 0x454   : > { %v1861_v10 = vadd.f32 %v1860_v27, %v3958_v7  ;;  %v1965_v30 = vsub.f32 %v3008_v21, %v1869_v11 }
 0x455   : > { %v2842_v35 = vpop.f32.mrf.mxu1  ;;  %v2234_v26 = vadd.f32 %v2233_v20, %v2232_v3  ;;  %v3016_v3 = vld [vmem:[%s3093_s28 + $0x90] sm:$0xff] }
 0x456   : > { %v1963_v12 = vsub.f32 %v3007_v19, %v1861_v10  ;;  %v1872_v0 = vadd.f32 %v2842_v35, %v3958_v7  ;;  %v2198_v56 = vmul.f32 %v1965_v30, %v1965_v30 }
 0x457   : > { %v1863_v45 = vpop.f32.mrf.mxu1 }
 0x458   : > { %v2196_v43 = vmul.f32 %v1963_v12, %v1963_v12  ;;  %v1864_v47 = vadd.f32 %v1863_v45, %v3958_v7  ;;  %v1966_v16 = vsub.f32 %v3010_v58, %v1872_v0  ;;  %v2239_v33 = vsel %vm392_vm0, %v2198_v56, 0.0  ;;  %v3017_v45 = vld [vmem:[%s3093_s28 + $0x98] sm:$0xff] }
 0x45a   : > { %v2235_v14 = vsel %vm392_vm0, %v2196_v43, 0.0  ;;  %v1964_v39 = vsub.f32 %v3009_v31, %v1864_v47  ;;  %v2199_v41 = vmul.f32 %v1966_v16, %v1966_v16  ;;  %v3018_v47 = vld [vmem:[%s3093_s28 + $0x88] sm:$0xff] }
 0x45b   : > { %v2236_v63 = vadd.f32 %v2235_v14, %v2234_v26 }
 0x45c   : > { %v2197_v23 = vmul.f32 %v1964_v39, %v1964_v39  ;;  %v2241_v57 = vsel %vm392_vm0, %v2199_v41, 0.0 }
 0x45e   : > { %v2237_v24 = vsel %vm392_vm0, %v2197_v23, 0.0 }
 0x45f   : > { %v2238_v55 = vadd.f32 %v2237_v24, %v2236_v63  ;;  %v2845_v1 = vpop.f32.mrf.mxu1 }
 0x460   : > { %v1885_v54 = vadd.f32 %v2845_v1, %v3958_v7 }
 0x461   : > { %v2240_v9 = vadd.f32 %v2239_v33, %v2238_v55  ;;  %v1876_v49 = vpop.f32.mrf.mxu1  ;;  %v3019_v55 = vld [vmem:[%s3093_s28 + $0xa0] sm:$0xff] }
 0x462   : > { %v1877_v6 = vadd.f32 %v1876_v49, %v3958_v7  ;;  %v1969_v48 = vsub.f32 %v3012_v8, %v1885_v54  ;;  %v3020_v54 = vld [vmem:[%s3093_s28 + $0xb0] sm:$0xff]  ;;  %v3022_v8 = vld [vmem:[%s3093_s28 + $0xa8] sm:$0xff] }
 0x463   : > { %v2846_v53 = vpop.f32.mrf.mxu1  ;;  %v2242_v51 = vadd.f32 %v2241_v57, %v2240_v9 }
 0x464   : > { %v1967_v42 = vsub.f32 %v3011_v25, %v1877_v6  ;;  %v1888_v4 = vadd.f32 %v2846_v53, %v3958_v7  ;;  %v2202_v28 = vmul.f32 %v1969_v48, %v1969_v48 }
 0x465   : > { %v1879_v17 = vpop.f32.mrf.mxu1 }
 0x466   : > { %v2200_v29 = vmul.f32 %v1967_v42, %v1967_v42  ;;  %v1880_v44 = vadd.f32 %v1879_v17, %v3958_v7  ;;  %v1970_v38 = vsub.f32 %v3013_v2, %v1888_v4  ;;  %v2247_v11 = vsel %vm392_vm0, %v2202_v28, 0.0  ;;  %v3023_v28 = vld [vmem:[%s3093_s28 + $0xc0] sm:$0xff] }
 0x467   : > { %v2849_v52 = vpop.f32.mrf.mxu1 }
 0x468   : > { %v2243_v34 = vsel %vm392_vm0, %v2200_v29, 0.0  ;;  %v1968_v5 = vsub.f32 %v3014_v40, %v1880_v44  ;;  %v1901_v18 = vadd.f32 %v2849_v52, %v3958_v7  ;;  %v2203_v59 = vmul.f32 %v1970_v38, %v1970_v38 }
 0x469   : > { %v2244_v46 = vadd.f32 %v2243_v34, %v2242_v51  ;;  %v1892_v13 = vpop.f32.mrf.mxu1  ;;  %v3021_v51 = vld [vmem:[%s3093_s28 + $0xb8] sm:$0xff] }
 0x46a   : > { %v2201_v36 = vmul.f32 %v1968_v5, %v1968_v5  ;;  %v1893_v15 = vadd.f32 %v1892_v13, %v3958_v7  ;;  %v1973_v27 = vsub.f32 %v3016_v3, %v1901_v18  ;;  %v2249_v26 = vsel %vm392_vm0, %v2203_v59, 0.0  ;;  %v3024_v59 = vld [vmem:[%s3093_s28 + $0xd0] sm:$0xff] }
 0x46b   : > { %v2850_v50 = vpop.f32.mrf.mxu1 }
 0x46c   : > { %v2245_v32 = vsel %vm392_vm0, %v2201_v36, 0.0  ;;  %v1971_v37 = vsub.f32 %v3015_v60, %v1893_v15  ;;  %v1904_v22 = vadd.f32 %v2850_v50, %v3958_v7  ;;  %v2206_v30 = vmul.f32 %v1973_v27, %v1973_v27 }
 0x46d   : > { %v2246_v61 = vadd.f32 %v2245_v32, %v2244_v46  ;;  %v1895_v10 = vpop.f32.mrf.mxu1 }
 0x46e   : > { %v2204_v35 = vmul.f32 %v1971_v37, %v1971_v37  ;;  %v1896_v20 = vadd.f32 %v1895_v10, %v3958_v7  ;;  %v1974_v43 = vsub.f32 %v3017_v45, %v1904_v22  ;;  %v2255_v49 = vsel %vm392_vm0, %v2206_v30, 0.0 }
 0x46f   : > { %v2248_v19 = vadd.f32 %v2247_v11, %v2246_v61  ;;  %v2853_v12 = vpop.f32.mrf.mxu1  ;;  %v3025_v11 = vld [vmem:[%s3093_s28 + $0xd8] sm:$0xff] }
 0x470   : > { %v1972_v21 = vsub.f32 %v3018_v47, %v1896_v20  ;;  %v2251_v31 = vsel %vm392_vm0, %v2204_v35, 0.0  ;;  %v1917_v63 = vadd.f32 %v2853_v12, %v3958_v7  ;;  %v2207_v16 = vmul.f32 %v1974_v43, %v1974_v43  ;;  %v3026_v20 = vld [vmem:[%s3093_s28 + $0xc8] sm:$0xff] }
 0x471   : > { %v2250_v0 = vadd.f32 %v2249_v26, %v2248_v19  ;;  %v1908_v14 = vpop.f32.mrf.mxu1 }
 0x472   : > { %v2205_v39 = vmul.f32 %v1972_v21, %v1972_v21  ;;  %v1909_v23 = vadd.f32 %v1908_v14, %v3958_v7  ;;  %v1977_v6 = vsub.f32 %v3020_v54, %v1917_v63  ;;  %v2257_v4 = vsel %vm392_vm0, %v2207_v16, 0.0  ;;  %v3027_v63 = vld [vmem:[%s3093_s28 + $0xe0] sm:$0xff]  ;;  %v3029_v54 = vld [vmem:[%s3093_s28 + $0xf8] sm:$0xff] }
 0x473   : > { %v2252_v56 = vadd.f32 %v2251_v31, %v2250_v0  ;;  %v2854_v58 = vpop.f32.mrf.mxu1 }
 0x474   : > { %v2253_v24 = vsel %vm392_vm0, %v2205_v39, 0.0  ;;  %v1975_v1 = vsub.f32 %v3019_v55, %v1909_v23  ;;  %v1920_v33 = vadd.f32 %v2854_v58, %v3958_v7  ;;  %v2210_v34 = vmul.f32 %v1977_v6, %v1977_v6  ;;  %v3028_v55 = vld [vmem:[%s3093_s28 + $0xf0] sm:$0xff] }
 0x475   : > { %v2254_v41 = vadd.f32 %v2253_v24, %v2252_v56  ;;  %v1911_v9 = vpop.f32.mrf.mxu1 }
 0x476   : > { %v2208_v53 = vmul.f32 %v1975_v1, %v1975_v1  ;;  %v1912_v57 = vadd.f32 %v1911_v9, %v3958_v7  ;;  %v1978_v17 = vsub.f32 %v3021_v51, %v1920_v33  ;;  %v2263_v37 = vsel %vm392_vm0, %v2210_v34, 0.0 }
 0x477   : > { %v2256_v25 = vadd.f32 %v2255_v49, %v2254_v41  ;;  %v2857_v42 = vpop.f32.mrf.mxu1 }
 0x478   : > { %v1976_v48 = vsub.f32 %v3022_v8, %v1912_v57  ;;  %v1933_v44 = vadd.f32 %v2857_v42, %v3958_v7  ;;  %v2259_v2 = vsel %vm392_vm0, %v2208_v53, 0.0  ;;  %v2211_v18 = vmul.f32 %v1978_v17, %v1978_v17  ;;  %v3030_v53 = vld [vmem:[%s3093_s28 + $0xe8] sm:$0xff]  ;;  %s2880_s28 = spop %2879 }
 0x479   : > { %v2258_v29 = vadd.f32 %v2257_v4, %v2256_v25  ;;  %v1924_v52 = vpop.f32.mrf.mxu1  ;;  %s2187_s20 = smul.f32 0.5, %s2880_s28 }
 0x47a   : > { %v2209_v38 = vmul.f32 %v1976_v48, %v1976_v48  ;;  %v1925_v40 = vadd.f32 %v1924_v52, %v3958_v7  ;;  %v1981_v32 = vsub.f32 %v3024_v59, %v1933_v44  ;;  %v2265_v10 = vsel %vm392_vm0, %v2211_v18, 0.0 }
 0x47b   : > { %v2260_v5 = vadd.f32 %v2259_v2, %v2258_v29  ;;  %v2858_v46 = vpop.f32.mrf.mxu1 }
 0x47c   : > { %v2261_v13 = vsel %vm392_vm0, %v2209_v38, 0.0  ;;  %v1979_v36 = vsub.f32 %v3023_v28, %v1925_v40  ;;  %v1936_v15 = vadd.f32 %v2858_v46, %v3958_v7  ;;  %v2214_v12 = vmul.f32 %v1981_v32, %v1981_v32 }
 0x47d   : > { %v2262_v50 = vadd.f32 %v2261_v13, %v2260_v5  ;;  %v1927_v60 = vpop.f32.mrf.mxu1  ;;  %v4100_v28 = vlaneseq }
 0x47e   : > { %v2212_v22 = vmul.f32 %v1979_v36, %v1979_v36  ;;  %v1928_v61 = vadd.f32 %v1927_v60, %v3958_v7  ;;  %v1982_v35 = vsub.f32 %v3025_v11, %v1936_v15  ;;  %v2271_v24 = vsel %vm392_vm0, %v2214_v12, 0.0 }
 0x47f   : > { %v2264_v3 = vadd.f32 %v2263_v37, %v2262_v50  ;;  %v2861_v27 = vpop.f32.mrf.mxu1  ;;  %v2295_v36 = vand.u32 127, %v4100_v28  ;;  %v2303_v50 = vstv %s2187_s20 }
 0x480   : > { %v1980_v19 = vsub.f32 %v3026_v20, %v1928_v61  ;;  %v2267_v43 = vsel %vm392_vm0, %v2212_v22, 0.0  ;;  %v1949_v21 = vadd.f32 %v2861_v27, %v3958_v7  ;;  %v2215_v31 = vmul.f32 %v1982_v35, %v1982_v35 }
 0x481   : > { %v2266_v26 = vadd.f32 %v2265_v10, %v2264_v3  ;;  %v1940_v45 = vpop.f32.mrf.mxu1  ;;  %vm2299_vm2 = vcmp.eq.s32.totalorder %v2295_v36, 1  ;;  %vm2297_vm3 = vcmp.eq.s32.totalorder %v2295_v36, 0 }
 0x482   : > { %v2213_v47 = vmul.f32 %v1980_v19, %v1980_v19  ;;  %v1941_v30 = vadd.f32 %v1940_v45, %v3958_v7  ;;  %v1985_v1 = vsub.f32 %v3028_v55, %v1949_v21  ;;  %v2273_v49 = vsel %vm392_vm0, %v2215_v31, 0.0  ;;  %vm2300_vm4 = vmand %vm2296_vm1, %vm2299_vm2 }
 0x483   : > { %v2268_v0 = vadd.f32 %v2267_v43, %v2266_v26  ;;  %v2862_v14 = vpop.f32.mrf.mxu1  ;;  %vm2298_vm5 = vmand %vm2296_vm1, %vm2297_vm3 }
 0x484   : > { %v2269_v39 = vsel %vm392_vm0, %v2213_v47, 0.0  ;;  %v1983_v23 = vsub.f32 %v3027_v63, %v1941_v30  ;;  %v1952_v56 = vadd.f32 %v2862_v14, %v3958_v7  ;;  %v2218_v42 = vmul.f32 %v1985_v1, %v1985_v1 }
 0x485   : > { %v2270_v58 = vadd.f32 %v2269_v39, %v2268_v0  ;;  %v1943_v16 = vpop.f32.mrf.mxu1 }
 0x486   : > { %v2216_v33 = vmul.f32 %v1983_v23, %v1983_v23  ;;  %v1944_v41 = vadd.f32 %v1943_v16, %v3958_v7  ;;  %v1986_v6 = vsub.f32 %v3029_v54, %v1952_v56  ;;  %v2279_v7 = vsel %vm392_vm0, %v2218_v42, 0.0 }
 0x487   : > { %v2272_v9 = vadd.f32 %v2271_v24, %v2270_v58 }
 0x488   : > { %v1984_v57 = vsub.f32 %v3030_v53, %v1944_v41  ;;  %v2275_v4 = vsel %vm392_vm0, %v2216_v33, 0.0  ;;  %v2219_v8 = vmul.f32 %v1986_v6, %v1986_v6 }
 0x489   : > { %v2274_v25 = vadd.f32 %v2273_v49, %v2272_v9 }
 0x48a   : > { %v2217_v51 = vmul.f32 %v1984_v57, %v1984_v57  ;;  %v2281_v52 = vsel %vm392_vm0, %v2219_v8, 0.0 }
 0x48b   : > { %v2276_v17 = vadd.f32 %v2275_v4, %v2274_v25 }
 0x48c   : > { %v2277_v48 = vsel %vm392_vm0, %v2217_v51, 0.0 }
 0x48d   : > { %v2278_v29 = vadd.f32 %v2277_v48, %v2276_v17 }
 0x48f   : > { %v2280_v44 = vadd.f32 %v2279_v7, %v2278_v29 }
 0x491   : > { %v2282_v34 = vadd.f32 %v2281_v52, %v2280_v44 }
 0x493   : > { %2283 = vadd.xlane.f32.xlu0 %v2282_v34 }
 0x51c   : > { %v2284_v2 = vpop.xlane.xlu0 %2283 }
 0x51d   : > { %v2285_v38 = vrot.slane %v2284_v2, 4 }
 0x51f   : > { %v2286_v40 = vadd.f32 %v2285_v38, %v2284_v2 }
 0x521   : > { %v2287_v5 = vrot.slane %v2286_v40, 2 }
 0x523   : > { %v2288_v46 = vadd.f32 %v2287_v5, %v2286_v40 }
 0x525   : > { %v2289_v18 = vrot.slane %v2288_v46, 1 }
 0x527   : > { %v2290_v13 = vadd.f32 %v2289_v18, %v2288_v46 }
 0x529   : > { %2881 = vpush %v2290_v13 }
 0x55a   : > { %s2882_s22 = spop %2881 }
 0x55b   : > { %v2301_v15 = vstv %s2882_s22 }
 0x55c   : > { %v2302_v59 = vsel %vm2300_vm4, %v2301_v15, 0.0 }
 0x55d   : > { %v2304_v32 = vsel %vm2298_vm5, %v2303_v50, %v2302_v59 }
 0x55e   : > { %2305 = vst [vmem:[%s192_s26] sm:$0xff] %v2304_v32 }
 0x55f PF: > { %s13_s12 = sadd.s32 1, %s3037_s12  }
 0x560   : > { %p10_p5 = scmp.ge.s32.totalorder %s13_s12, 4  }
 0x562   :  { %12 = sbr.rel (!%p10_p5) target bundleno = 1 (0x1), region = 65 }

</bundles_post_ra>
